<compile_context>
chip_gen: v6e
topology: v6e:2x2x1
jax: 0.10.0
libtpu: 0.0.40
codegen_flags: <defaults>
</compile_context>

<pallas_src>
import math

import jax
import jax.numpy as jnp
import numpy as np
from jax.experimental import pallas as pl
from jax.experimental.pallas import tpu as pltpu

LN_EPS = 1e-5


def _layernorm(x, g, b):
    mu = jnp.mean(x, axis=-1, keepdims=True)
    var = jnp.mean((x - mu) ** 2, axis=-1, keepdims=True)
    return (x - mu) * jax.lax.rsqrt(var + LN_EPS) * g + b


# --------------------------------------------------------------------------
# Fused encoder-layer kernel (single invocation, everything VMEM resident).
# --------------------------------------------------------------------------
def _make_fused_kernel(B, S, D, nhead):
    DFF = 2 * D
    HD = D // nhead
    bf16 = jnp.bfloat16

    def kernel(z1_ref, ln1_g, ln1_b, wqkv_ref, bqkv_ref, wo_ref, bo_ref,
               ln2_g, ln2_b, w1_ref, b1_ref, cw_ref, cb_ref,
               out_ref, ffpad):
        # ---- gather per-batch rows from the native (S, B, D) layout ----
        # row index = b*S + s  (batch-major, seq-minor)
        x_rows = jnp.concatenate([z1_ref[:, b, :] for b in range(B)], axis=0)  # (B*S, D) f32

        # ---- LayerNorm1 + fused QKV projection (one MXU push, 3D-wide) ----
        xn = _layernorm(x_rows, ln1_g[...], ln1_b[...])
        qkv = jnp.dot(xn.astype(bf16), wqkv_ref[...],
                      preferred_element_type=jnp.float32) + bqkv_ref[...]      # (B*S, 3D) f32

        # ---- multi-head self-attention: all (batch, head) pairs batched ----
        def heads(base):
            return jnp.stack(
                [qkv[b * S:(b + 1) * S, base + h * HD: base + (h + 1) * HD]
                 for b in range(B) for h in range(nhead)], axis=0)             # (B*NH, S, HD)

        qh = heads(0)          # 1/sqrt(HD) scale pre-folded into Wq / bq
        kh = heads(D)
        vh = heads(2 * D)

        s = jnp.einsum("hqd,hkd->hqk", qh.astype(bf16), kh.astype(bf16),
                       preferred_element_type=jnp.float32)                     # (B*NH, S, S)
        s = s - jnp.max(s, axis=-1, keepdims=True)
        e = jnp.exp(s)
        p = e * pl.reciprocal(jnp.sum(e, axis=-1, keepdims=True), approx=True)
        o = jnp.einsum("hqk,hkd->hqd", p.astype(bf16), vh.astype(bf16),
                       preferred_element_type=jnp.float32)                     # (B*NH, S, HD)

        # re-assemble heads on the lane axis, batches on the sublane axis
        attn = jnp.concatenate(
            [jnp.concatenate([o[b * nhead + h] for h in range(nhead)], axis=-1)
             for b in range(B)], axis=0)                                       # (B*S, D) f32

        # ---- out_proj + residual + LayerNorm2 + Linear(D, 2D) + ReLU ----
        z2 = jnp.dot(attn.astype(bf16), wo_ref[...],
                     preferred_element_type=jnp.float32) + bo_ref[...]
        resid = z2 + x_rows                                                    # z2 + z1
        yn = _layernorm(resid, ln2_g[...], ln2_b[...])
        ff = jnp.maximum(
            jnp.dot(yn.astype(bf16), w1_ref[...],
                    preferred_element_type=jnp.float32) + b1_ref[...], 0.0)    # (B*S, 2D)

        # ---- stage ff with a zero halo for the 3x3 conv (H == batch, W == seq) ----
        ffpad[...] = jnp.zeros(ffpad.shape, ffpad.dtype)
        for b in range(B):
            ffpad[1 + b, 1:1 + S, :] = ff[b * S:(b + 1) * S, :]

        # ---- 3x3 conv as one im2col contraction per batch row + final residual ----
        for b in range(B):
            patches = jnp.concatenate(
                [ffpad[b + kh, kw:kw + S, :] for kh in range(3) for kw in range(3)],
                axis=-1)                                                       # (S, 9*2D)
            conv = jnp.dot(patches.astype(bf16), cw_ref[...],
                           preferred_element_type=jnp.float32) + cb_ref[...]   # (S, D)
            out_ref[:, b, :] = conv + resid[b * S:(b + 1) * S, :]              # z3 = conv+z2+z1

    return kernel


def transformer_encoder_layer(z1_sbd, p, nhead):
    """z1_sbd: (S, B, D) float32, same convention as the PyTorch module."""
    S, B, D = z1_sbd.shape
    DFF = 2 * D
    kernel = _make_fused_kernel(B, S, D, nhead)

    def full(shape):
        nd = len(shape)
        return pl.BlockSpec(shape, lambda i: (0,) * nd)

    in_specs = [
        full((S, B, D)),                       # z1
        full((1, D)), full((1, D)),            # LayerNorm1 gamma / beta
        full((D, 3 * D)), full((1, 3 * D)),    # fused Wqkv^T (bf16), bqkv
        full((D, D)), full((1, D)),            # Wo^T (bf16), bo
        full((1, D)), full((1, D)),            # LayerNorm2 gamma / beta
        full((D, DFF)), full((1, DFF)),        # W1^T (bf16), b1
        full((9 * DFF, D)), full((1, D)),      # im2col conv weight (bf16), conv bias
    ]

    return pl.pallas_call(
        kernel,
        out_shape=jax.ShapeDtypeStruct((S, B, D), jnp.float32),
        grid_spec=pltpu.PrefetchScalarGridSpec(
            num_scalar_prefetch=0,
            grid=(1,),
            in_specs=in_specs,
            out_specs=full((S, B, D)),
            scratch_shapes=[pltpu.VMEM((B + 2, S + 2, DFF), jnp.float32)],  # ff + conv halo
        ),
        compiler_params=pltpu.CompilerParams(dimension_semantics=("arbitrary",)),
    )(
        z1_sbd,
        p["ln1_g"], p["ln1_b"],
        p["wqkv_t"], p["bqkv"],
        p["wo_t"], p["bo"],
        p["ln2_g"], p["ln2_b"],
        p["w1_t"], p["b1"],
        p["conv_wt"], p["conv_b"],
    )


# --------------------------------------------------------------------------
# Deterministic synthetic parameters (shapes match the PyTorch __init__).
# --------------------------------------------------------------------------
def init_raw_params(key, d_model):
    D, DFF = d_model, 2 * d_model
    ks = jax.random.split(key, 12)
    n = lambda k, shape, s: jax.random.normal(k, shape, jnp.float32) * s
    return {
        "ln1_g": 1.0 + 0.1 * jax.random.normal(ks[0], (D,), jnp.float32),
        "ln1_b": 0.05 * jax.random.normal(ks[1], (D,), jnp.float32),
        "in_w": n(ks[2], (3 * D, D), 1.0 / math.sqrt(D)),    # MHA in_proj_weight
        "in_b": 0.02 * jax.random.normal(ks[3], (3 * D,), jnp.float32),
        "wo": n(ks[4], (D, D), 1.0 / math.sqrt(D)),          # MHA out_proj
        "bo": 0.02 * jax.random.normal(ks[5], (D,), jnp.float32),
        "ln2_g": 1.0 + 0.1 * jax.random.normal(ks[6], (D,), jnp.float32),
        "ln2_b": 0.05 * jax.random.normal(ks[7], (D,), jnp.float32),
        "w1": n(ks[8], (DFF, D), 1.0 / math.sqrt(D)),        # Linear(D, 2D)
        "b1": 0.02 * jax.random.normal(ks[9], (DFF,), jnp.float32),
        "conv_w": n(ks[10], (D, DFF, 3, 3), 1.0 / math.sqrt(DFF * 9)),
        "conv_b": 0.02 * jax.random.normal(ks[11], (D,), jnp.float32),
    }


def prep_params(r, nhead):
    D = r["wo"].shape[0]
    HD = D // nhead
    scale = 1.0 / math.sqrt(HD)
    wq, wk, wv = jnp.split(r["in_w"], 3, axis=0)
    bq, bk, bv = jnp.split(r["in_b"], 3, axis=0)
    row = lambda v: v.reshape(1, -1).astype(jnp.float32)
    # Fold the 1/sqrt(head_dim) attention scale into Wq / bq (one-time prep).
    wqkv_t = jnp.concatenate([wq.T * scale, wk.T, wv.T], axis=1)        # (D, 3D)
    bqkv = jnp.concatenate([bq * scale, bk, bv], axis=0)                # (3D,)
    # (D, 2D, 3, 3) -> (kh, kw, ci, co) -> (9*2D, D) im2col weight.
    conv_wt = jnp.transpose(r["conv_w"], (2, 3, 1, 0)).reshape(-1, D)
    return {
        "ln1_g": row(r["ln1_g"]), "ln1_b": row(r["ln1_b"]),
        "wqkv_t": wqkv_t.astype(jnp.bfloat16), "bqkv": row(bqkv),
        "wo_t": r["wo"].T.astype(jnp.bfloat16), "bo": row(r["bo"]),
        "ln2_g": row(r["ln2_g"]), "ln2_b": row(r["ln2_b"]),
        "w1_t": r["w1"].T.astype(jnp.bfloat16), "b1": row(r["b1"]),
        "conv_wt": conv_wt.astype(jnp.bfloat16), "conv_b": row(r["conv_b"]),
    }


# --------------------------------------------------------------------------
# Pure-JAX reference mirroring the PyTorch forward exactly.
# --------------------------------------------------------------------------
def reference(z1, r, nhead):
    S, B, D = z1.shape
    HD = D // nhead
    wq, wk, wv = jnp.split(r["in_w"], 3, axis=0)
    bq, bk, bv = jnp.split(r["in_b"], 3, axis=0)
    ln1 = _layernorm(z1, r["ln1_g"], r["ln1_b"])
    q = ln1 @ wq.T + bq
    k = ln1 @ wk.T + bk
    v = ln1 @ wv.T + bv
    qh = q.reshape(S, B, nhead, HD) / math.sqrt(HD)
    kh = k.reshape(S, B, nhead, HD)
    vh = v.reshape(S, B, nhead, HD)
    s = jnp.einsum("sbhd,tbhd->bhst", qh, kh)
    p = jax.nn.softmax(s, axis=-1)
    o = jnp.einsum("bhst,tbhd->sbhd", p, vh).reshape(S, B, D)
    z2 = o @ r["wo"].T + r["bo"]
    y = _layernorm(z2 + z1, r["ln2_g"], r["ln2_b"])
    ff = jax.nn.relu(y @ r["w1"].T + r["b1"])                # (S, B, 2D)
    lin = jnp.transpose(ff, (2, 1, 0))[None]                 # (1, 2D, B, S)
    conv = jax.lax.conv_general_dilated(
        lin, r["conv_w"], window_strides=(1, 1), padding="SAME",
        dimension_numbers=("NCHW", "OIHW", "NCHW"))
    conv = conv + r["conv_b"][None, :, None, None]
    z3 = jnp.transpose(conv[0], (2, 1, 0))                   # (S, B, D)
    return z3 + z2 + z1


if __name__ == "__main__":
    S, B, D, NH = 8, 2, 32, 4
    key = jax.random.PRNGKey(0)
    kp, kx = jax.random.split(key)

    raw = init_raw_params(kp, D)
    params = prep_params(raw, NH)
    z1 = jax.random.normal(kx, (S, B, D), jnp.float32)

    out = transformer_encoder_layer(z1, params, NH)
    out = jax.block_until_ready(out)

    ref = reference(z1, raw, NH)
    np.testing.assert_allclose(np.asarray(out), np.asarray(ref), rtol=3e-2, atol=3e-2)
    print("KERNEL_OK")
</pallas_src>

<mosaic_0001>
module attributes {stable_mosaic.version = 11 : i64} {
  func.func @kernel(%arg0: i32, %arg1: memref<8x2x32xf32, #tpu.memory_space<vmem>>, %arg2: memref<1x32xf32, #tpu.memory_space<vmem>>, %arg3: memref<1x32xf32, #tpu.memory_space<vmem>>, %arg4: memref<32x96xbf16, #tpu.memory_space<vmem>>, %arg5: memref<1x96xf32, #tpu.memory_space<vmem>>, %arg6: memref<32x32xbf16, #tpu.memory_space<vmem>>, %arg7: memref<1x32xf32, #tpu.memory_space<vmem>>, %arg8: memref<1x32xf32, #tpu.memory_space<vmem>>, %arg9: memref<1x32xf32, #tpu.memory_space<vmem>>, %arg10: memref<32x64xbf16, #tpu.memory_space<vmem>>, %arg11: memref<1x64xf32, #tpu.memory_space<vmem>>, %arg12: memref<576x32xbf16, #tpu.memory_space<vmem>>, %arg13: memref<1x32xf32, #tpu.memory_space<vmem>>, %arg14: memref<8x2x32xf32, #tpu.memory_space<vmem>>, %arg15: memref<4x10x64xf32, #tpu.memory_space<vmem>>) attributes {dimension_semantics = [#tpu.dimension_semantics<arbitrary>], iteration_bounds = array<i64: 1>, scalar_prefetch = 0 : i64, scratch_operands = 1 : i64, tpu.core_type = #tpu.core_type<tc>, window_params = [{pipeline_mode = #tpu.pipeline_mode<synchronous>, transform_indices = @transform_0, window_bounds = array<i64: 8, 2, 32>}, {pipeline_mode = #tpu.pipeline_mode<synchronous>, transform_indices = @transform_1, window_bounds = array<i64: 1, 32>}, {pipeline_mode = #tpu.pipeline_mode<synchronous>, transform_indices = @transform_2, window_bounds = array<i64: 1, 32>}, {pipeline_mode = #tpu.pipeline_mode<synchronous>, transform_indices = @transform_3, window_bounds = array<i64: 32, 96>}, {pipeline_mode = #tpu.pipeline_mode<synchronous>, transform_indices = @transform_4, window_bounds = array<i64: 1, 96>}, {pipeline_mode = #tpu.pipeline_mode<synchronous>, transform_indices = @transform_5, window_bounds = array<i64: 32, 32>}, {pipeline_mode = #tpu.pipeline_mode<synchronous>, transform_indices = @transform_6, window_bounds = array<i64: 1, 32>}, {pipeline_mode = #tpu.pipeline_mode<synchronous>, transform_indices = @transform_7, window_bounds = array<i64: 1, 32>}, {pipeline_mode = #tpu.pipeline_mode<synchronous>, transform_indices = @transform_8, window_bounds = array<i64: 1, 32>}, {pipeline_mode = #tpu.pipeline_mode<synchronous>, transform_indices = @transform_9, window_bounds = array<i64: 32, 64>}, {pipeline_mode = #tpu.pipeline_mode<synchronous>, transform_indices = @transform_10, window_bounds = array<i64: 1, 64>}, {pipeline_mode = #tpu.pipeline_mode<synchronous>, transform_indices = @transform_11, window_bounds = array<i64: 576, 32>}, {pipeline_mode = #tpu.pipeline_mode<synchronous>, transform_indices = @transform_12, window_bounds = array<i64: 1, 32>}, {pipeline_mode = #tpu.pipeline_mode<synchronous>, transform_indices = @transform_13, window_bounds = array<i64: 8, 2, 32>}]} {
    %c0 = arith.constant 0 : index
    %c0_0 = arith.constant 0 : index
    %c0_1 = arith.constant 0 : index
    %0 = vector.load %arg1[%c0, %c0_0, %c0_1] : memref<8x2x32xf32, #tpu.memory_space<vmem>>, vector<8x1x32xf32>
    %1 = vector.shape_cast %0 : vector<8x1x32xf32> to vector<8x32xf32>
    %c0_2 = arith.constant 0 : index
    %c1 = arith.constant 1 : index
    %c0_3 = arith.constant 0 : index
    %2 = vector.load %arg1[%c0_2, %c1, %c0_3] : memref<8x2x32xf32, #tpu.memory_space<vmem>>, vector<8x1x32xf32>
    %3 = vector.shape_cast %2 : vector<8x1x32xf32> to vector<8x32xf32>
    %4 = tpu.concatenate %1, %3 in 0 : vector<8x32xf32>, vector<8x32xf32> -> vector<16x32xf32>
    %c0_4 = arith.constant 0 : index
    %c0_5 = arith.constant 0 : index
    %5 = vector.load %arg2[%c0_4, %c0_5] : memref<1x32xf32, #tpu.memory_space<vmem>>, vector<1x32xf32>
    %c0_6 = arith.constant 0 : index
    %c0_7 = arith.constant 0 : index
    %6 = vector.load %arg3[%c0_6, %c0_7] : memref<1x32xf32, #tpu.memory_space<vmem>>, vector<1x32xf32>
    %cst = arith.constant dense<0.000000e+00> : vector<16xf32>
    %7 = vector.multi_reduction <add>, %4, %cst [1] : vector<16x32xf32> to vector<16xf32>
    %8 = vector.shape_cast %7 : vector<16xf32> to vector<16x1xf32>
    %cst_8 = arith.constant 3.200000e+01 : f32
    %9 = vector.broadcast %cst_8 : f32 to vector<16x1xf32>
    %10 = arith.divf %8, %9 : vector<16x1xf32>
    %11 = vector.broadcast %10 : vector<16x1xf32> to vector<16x32xf32>
    %12 = arith.subf %4, %11 : vector<16x32xf32>
    %13 = arith.mulf %12, %12 : vector<16x32xf32>
    %cst_9 = arith.constant dense<0.000000e+00> : vector<16xf32>
    %14 = vector.multi_reduction <add>, %13, %cst_9 [1] : vector<16x32xf32> to vector<16xf32>
    %15 = vector.shape_cast %14 : vector<16xf32> to vector<16x1xf32>
    %cst_10 = arith.constant 3.200000e+01 : f32
    %16 = vector.broadcast %cst_10 : f32 to vector<16x1xf32>
    %17 = arith.divf %15, %16 : vector<16x1xf32>
    %18 = vector.broadcast %10 : vector<16x1xf32> to vector<16x32xf32>
    %19 = arith.subf %4, %18 : vector<16x32xf32>
    %cst_11 = arith.constant 9.99999974E-6 : f32
    %20 = vector.broadcast %cst_11 : f32 to vector<16x1xf32>
    %21 = arith.addf %17, %20 : vector<16x1xf32>
    %22 = math.rsqrt %21 : vector<16x1xf32>
    %23 = vector.broadcast %22 : vector<16x1xf32> to vector<16x32xf32>
    %24 = arith.mulf %19, %23 : vector<16x32xf32>
    %25 = vector.broadcast %5 : vector<1x32xf32> to vector<16x32xf32>
    %26 = arith.mulf %24, %25 : vector<16x32xf32>
    %27 = vector.broadcast %6 : vector<1x32xf32> to vector<16x32xf32>
    %28 = arith.addf %26, %27 : vector<16x32xf32>
    %29 = arith.truncf %28 : vector<16x32xf32> to vector<16x32xbf16>
    %c0_12 = arith.constant 0 : index
    %c0_13 = arith.constant 0 : index
    %30 = vector.load %arg4[%c0_12, %c0_13] : memref<32x96xbf16, #tpu.memory_space<vmem>>, vector<32x96xbf16>
    %cst_14 = arith.constant dense<0.000000e+00> : vector<16x96xf32>
    %31 = tpu.matmul %29, %30, %cst_14 {dimension_numbers = #tpu.dot_dimension_numbers<[1], [0], [0], [1], [0, 0, 1, 1], [], []>} : vector<16x32xbf16>, vector<32x96xbf16>, vector<16x96xf32> -> vector<16x96xf32>
    %c0_15 = arith.constant 0 : index
    %c0_16 = arith.constant 0 : index
    %32 = vector.load %arg5[%c0_15, %c0_16] : memref<1x96xf32, #tpu.memory_space<vmem>>, vector<1x96xf32>
    %33 = vector.broadcast %32 : vector<1x96xf32> to vector<16x96xf32>
    %34 = arith.addf %31, %33 : vector<16x96xf32>
    %35 = vector.extract_strided_slice %34 {offsets = [0, 0], sizes = [8, 8], strides = [1, 1]} : vector<16x96xf32> to vector<8x8xf32>
    %36 = vector.extract_strided_slice %34 {offsets = [0, 8], sizes = [8, 8], strides = [1, 1]} : vector<16x96xf32> to vector<8x8xf32>
    %37 = vector.extract_strided_slice %34 {offsets = [0, 16], sizes = [8, 8], strides = [1, 1]} : vector<16x96xf32> to vector<8x8xf32>
    %38 = vector.extract_strided_slice %34 {offsets = [0, 24], sizes = [8, 8], strides = [1, 1]} : vector<16x96xf32> to vector<8x8xf32>
    %39 = vector.extract_strided_slice %34 {offsets = [8, 0], sizes = [8, 8], strides = [1, 1]} : vector<16x96xf32> to vector<8x8xf32>
    %40 = vector.extract_strided_slice %34 {offsets = [8, 8], sizes = [8, 8], strides = [1, 1]} : vector<16x96xf32> to vector<8x8xf32>
    %41 = vector.extract_strided_slice %34 {offsets = [8, 16], sizes = [8, 8], strides = [1, 1]} : vector<16x96xf32> to vector<8x8xf32>
    %42 = vector.extract_strided_slice %34 {offsets = [8, 24], sizes = [8, 8], strides = [1, 1]} : vector<16x96xf32> to vector<8x8xf32>
    %43 = vector.shape_cast %35 : vector<8x8xf32> to vector<1x8x8xf32>
    %44 = vector.shape_cast %36 : vector<8x8xf32> to vector<1x8x8xf32>
    %45 = vector.shape_cast %37 : vector<8x8xf32> to vector<1x8x8xf32>
    %46 = vector.shape_cast %38 : vector<8x8xf32> to vector<1x8x8xf32>
    %47 = vector.shape_cast %39 : vector<8x8xf32> to vector<1x8x8xf32>
    %48 = vector.shape_cast %40 : vector<8x8xf32> to vector<1x8x8xf32>
    %49 = vector.shape_cast %41 : vector<8x8xf32> to vector<1x8x8xf32>
    %50 = vector.shape_cast %42 : vector<8x8xf32> to vector<1x8x8xf32>
    %51 = tpu.concatenate %43, %44, %45, %46, %47, %48, %49, %50 in 0 : vector<1x8x8xf32>, vector<1x8x8xf32>, vector<1x8x8xf32>, vector<1x8x8xf32>, vector<1x8x8xf32>, vector<1x8x8xf32>, vector<1x8x8xf32>, vector<1x8x8xf32> -> vector<8x8x8xf32>
    %52 = vector.extract_strided_slice %34 {offsets = [0, 32], sizes = [8, 8], strides = [1, 1]} : vector<16x96xf32> to vector<8x8xf32>
    %53 = vector.extract_strided_slice %34 {offsets = [0, 40], sizes = [8, 8], strides = [1, 1]} : vector<16x96xf32> to vector<8x8xf32>
    %54 = vector.extract_strided_slice %34 {offsets = [0, 48], sizes = [8, 8], strides = [1, 1]} : vector<16x96xf32> to vector<8x8xf32>
    %55 = vector.extract_strided_slice %34 {offsets = [0, 56], sizes = [8, 8], strides = [1, 1]} : vector<16x96xf32> to vector<8x8xf32>
    %56 = vector.extract_strided_slice %34 {offsets = [8, 32], sizes = [8, 8], strides = [1, 1]} : vector<16x96xf32> to vector<8x8xf32>
    %57 = vector.extract_strided_slice %34 {offsets = [8, 40], sizes = [8, 8], strides = [1, 1]} : vector<16x96xf32> to vector<8x8xf32>
    %58 = vector.extract_strided_slice %34 {offsets = [8, 48], sizes = [8, 8], strides = [1, 1]} : vector<16x96xf32> to vector<8x8xf32>
    %59 = vector.extract_strided_slice %34 {offsets = [8, 56], sizes = [8, 8], strides = [1, 1]} : vector<16x96xf32> to vector<8x8xf32>
    %60 = vector.shape_cast %52 : vector<8x8xf32> to vector<1x8x8xf32>
    %61 = vector.shape_cast %53 : vector<8x8xf32> to vector<1x8x8xf32>
    %62 = vector.shape_cast %54 : vector<8x8xf32> to vector<1x8x8xf32>
    %63 = vector.shape_cast %55 : vector<8x8xf32> to vector<1x8x8xf32>
    %64 = vector.shape_cast %56 : vector<8x8xf32> to vector<1x8x8xf32>
    %65 = vector.shape_cast %57 : vector<8x8xf32> to vector<1x8x8xf32>
    %66 = vector.shape_cast %58 : vector<8x8xf32> to vector<1x8x8xf32>
    %67 = vector.shape_cast %59 : vector<8x8xf32> to vector<1x8x8xf32>
    %68 = tpu.concatenate %60, %61, %62, %63, %64, %65, %66, %67 in 0 : vector<1x8x8xf32>, vector<1x8x8xf32>, vector<1x8x8xf32>, vector<1x8x8xf32>, vector<1x8x8xf32>, vector<1x8x8xf32>, vector<1x8x8xf32>, vector<1x8x8xf32> -> vector<8x8x8xf32>
    %69 = vector.extract_strided_slice %34 {offsets = [0, 64], sizes = [8, 8], strides = [1, 1]} : vector<16x96xf32> to vector<8x8xf32>
    %70 = vector.extract_strided_slice %34 {offsets = [0, 72], sizes = [8, 8], strides = [1, 1]} : vector<16x96xf32> to vector<8x8xf32>
    %71 = vector.extract_strided_slice %34 {offsets = [0, 80], sizes = [8, 8], strides = [1, 1]} : vector<16x96xf32> to vector<8x8xf32>
    %72 = vector.extract_strided_slice %34 {offsets = [0, 88], sizes = [8, 8], strides = [1, 1]} : vector<16x96xf32> to vector<8x8xf32>
    %73 = vector.extract_strided_slice %34 {offsets = [8, 64], sizes = [8, 8], strides = [1, 1]} : vector<16x96xf32> to vector<8x8xf32>
    %74 = vector.extract_strided_slice %34 {offsets = [8, 72], sizes = [8, 8], strides = [1, 1]} : vector<16x96xf32> to vector<8x8xf32>
    %75 = vector.extract_strided_slice %34 {offsets = [8, 80], sizes = [8, 8], strides = [1, 1]} : vector<16x96xf32> to vector<8x8xf32>
    %76 = vector.extract_strided_slice %34 {offsets = [8, 88], sizes = [8, 8], strides = [1, 1]} : vector<16x96xf32> to vector<8x8xf32>
    %77 = vector.shape_cast %69 : vector<8x8xf32> to vector<1x8x8xf32>
    %78 = vector.shape_cast %70 : vector<8x8xf32> to vector<1x8x8xf32>
    %79 = vector.shape_cast %71 : vector<8x8xf32> to vector<1x8x8xf32>
    %80 = vector.shape_cast %72 : vector<8x8xf32> to vector<1x8x8xf32>
    %81 = vector.shape_cast %73 : vector<8x8xf32> to vector<1x8x8xf32>
    %82 = vector.shape_cast %74 : vector<8x8xf32> to vector<1x8x8xf32>
    %83 = vector.shape_cast %75 : vector<8x8xf32> to vector<1x8x8xf32>
    %84 = vector.shape_cast %76 : vector<8x8xf32> to vector<1x8x8xf32>
    %85 = tpu.concatenate %77, %78, %79, %80, %81, %82, %83, %84 in 0 : vector<1x8x8xf32>, vector<1x8x8xf32>, vector<1x8x8xf32>, vector<1x8x8xf32>, vector<1x8x8xf32>, vector<1x8x8xf32>, vector<1x8x8xf32>, vector<1x8x8xf32> -> vector<8x8x8xf32>
    %86 = arith.truncf %51 : vector<8x8x8xf32> to vector<8x8x8xbf16>
    %87 = arith.truncf %68 : vector<8x8x8xf32> to vector<8x8x8xbf16>
    "tpu.trace_start"() <{level = 10 : i32, message = "hqd,hkd->hqk"}> : () -> ()
    %cst_17 = arith.constant dense<0.000000e+00> : vector<8x8x8xf32>
    %88 = tpu.matmul %86, %87, %cst_17 {dimension_numbers = #tpu.dot_dimension_numbers<[2], [2], [1], [1], [0, 0, 0, 1, 1, 1], [0], [0]>} : vector<8x8x8xbf16>, vector<8x8x8xbf16>, vector<8x8x8xf32> -> vector<8x8x8xf32>
    "tpu.trace_stop"() : () -> ()
    %cst_18 = arith.constant dense<0xFF800000> : vector<8x8xf32>
    %89 = vector.multi_reduction <maximumf>, %88, %cst_18 [2] : vector<8x8x8xf32> to vector<8x8xf32>
    %90 = vector.shape_cast %89 : vector<8x8xf32> to vector<8x8x1xf32>
    %91 = vector.broadcast %90 : vector<8x8x1xf32> to vector<8x8x8xf32>
    %92 = arith.subf %88, %91 : vector<8x8x8xf32>
    %93 = math.exp %92 : vector<8x8x8xf32>
    %cst_19 = arith.constant dense<0.000000e+00> : vector<8x8xf32>
    %94 = vector.multi_reduction <add>, %93, %cst_19 [2] : vector<8x8x8xf32> to vector<8x8xf32>
    %95 = vector.shape_cast %94 : vector<8x8xf32> to vector<8x8x1xf32>
    %96 = tpu.reciprocal %95 {approx = true} : vector<8x8x1xf32> -> vector<8x8x1xf32>
    %97 = vector.broadcast %96 : vector<8x8x1xf32> to vector<8x8x8xf32>
    %98 = arith.mulf %93, %97 : vector<8x8x8xf32>
    %99 = arith.truncf %98 : vector<8x8x8xf32> to vector<8x8x8xbf16>
    %100 = arith.truncf %85 : vector<8x8x8xf32> to vector<8x8x8xbf16>
    "tpu.trace_start"() <{level = 10 : i32, message = "hqk,hkd->hqd"}> : () -> ()
    %cst_20 = arith.constant dense<0.000000e+00> : vector<8x8x8xf32>
    %101 = tpu.matmul %99, %100, %cst_20 {dimension_numbers = #tpu.dot_dimension_numbers<[2], [1], [1], [2], [0, 0, 0, 1, 1, 2], [0], [0]>} : vector<8x8x8xbf16>, vector<8x8x8xbf16>, vector<8x8x8xf32> -> vector<8x8x8xf32>
    "tpu.trace_stop"() : () -> ()
    %102 = vector.extract_strided_slice %101 {offsets = [0, 0, 0], sizes = [1, 8, 8], strides = [1, 1, 1]} : vector<8x8x8xf32> to vector<1x8x8xf32>
    %103 = vector.shape_cast %102 : vector<1x8x8xf32> to vector<8x8xf32>
    %104 = vector.extract_strided_slice %101 {offsets = [1, 0, 0], sizes = [1, 8, 8], strides = [1, 1, 1]} : vector<8x8x8xf32> to vector<1x8x8xf32>
    %105 = vector.shape_cast %104 : vector<1x8x8xf32> to vector<8x8xf32>
    %106 = vector.extract_strided_slice %101 {offsets = [2, 0, 0], sizes = [1, 8, 8], strides = [1, 1, 1]} : vector<8x8x8xf32> to vector<1x8x8xf32>
    %107 = vector.shape_cast %106 : vector<1x8x8xf32> to vector<8x8xf32>
    %108 = vector.extract_strided_slice %101 {offsets = [3, 0, 0], sizes = [1, 8, 8], strides = [1, 1, 1]} : vector<8x8x8xf32> to vector<1x8x8xf32>
    %109 = vector.shape_cast %108 : vector<1x8x8xf32> to vector<8x8xf32>
    %110 = tpu.concatenate %103, %105, %107, %109 in 1 : vector<8x8xf32>, vector<8x8xf32>, vector<8x8xf32>, vector<8x8xf32> -> vector<8x32xf32>
    %111 = vector.extract_strided_slice %101 {offsets = [4, 0, 0], sizes = [1, 8, 8], strides = [1, 1, 1]} : vector<8x8x8xf32> to vector<1x8x8xf32>
    %112 = vector.shape_cast %111 : vector<1x8x8xf32> to vector<8x8xf32>
    %113 = vector.extract_strided_slice %101 {offsets = [5, 0, 0], sizes = [1, 8, 8], strides = [1, 1, 1]} : vector<8x8x8xf32> to vector<1x8x8xf32>
    %114 = vector.shape_cast %113 : vector<1x8x8xf32> to vector<8x8xf32>
    %115 = vector.extract_strided_slice %101 {offsets = [6, 0, 0], sizes = [1, 8, 8], strides = [1, 1, 1]} : vector<8x8x8xf32> to vector<1x8x8xf32>
    %116 = vector.shape_cast %115 : vector<1x8x8xf32> to vector<8x8xf32>
    %117 = vector.extract_strided_slice %101 {offsets = [7, 0, 0], sizes = [1, 8, 8], strides = [1, 1, 1]} : vector<8x8x8xf32> to vector<1x8x8xf32>
    %118 = vector.shape_cast %117 : vector<1x8x8xf32> to vector<8x8xf32>
    %119 = tpu.concatenate %112, %114, %116, %118 in 1 : vector<8x8xf32>, vector<8x8xf32>, vector<8x8xf32>, vector<8x8xf32> -> vector<8x32xf32>
    %120 = tpu.concatenate %110, %119 in 0 : vector<8x32xf32>, vector<8x32xf32> -> vector<16x32xf32>
    %121 = arith.truncf %120 : vector<16x32xf32> to vector<16x32xbf16>
    %c0_21 = arith.constant 0 : index
    %c0_22 = arith.constant 0 : index
    %122 = vector.load %arg6[%c0_21, %c0_22] : memref<32x32xbf16, #tpu.memory_space<vmem>>, vector<32x32xbf16>
    %cst_23 = arith.constant dense<0.000000e+00> : vector<16x32xf32>
    %123 = tpu.matmul %121, %122, %cst_23 {dimension_numbers = #tpu.dot_dimension_numbers<[1], [0], [0], [1], [0, 0, 1, 1], [], []>} : vector<16x32xbf16>, vector<32x32xbf16>, vector<16x32xf32> -> vector<16x32xf32>
    %c0_24 = arith.constant 0 : index
    %c0_25 = arith.constant 0 : index
    %124 = vector.load %arg7[%c0_24, %c0_25] : memref<1x32xf32, #tpu.memory_space<vmem>>, vector<1x32xf32>
    %125 = vector.broadcast %124 : vector<1x32xf32> to vector<16x32xf32>
    %126 = arith.addf %123, %125 : vector<16x32xf32>
    %127 = arith.addf %126, %4 : vector<16x32xf32>
    %c0_26 = arith.constant 0 : index
    %c0_27 = arith.constant 0 : index
    %128 = vector.load %arg8[%c0_26, %c0_27] : memref<1x32xf32, #tpu.memory_space<vmem>>, vector<1x32xf32>
    %c0_28 = arith.constant 0 : index
    %c0_29 = arith.constant 0 : index
    %129 = vector.load %arg9[%c0_28, %c0_29] : memref<1x32xf32, #tpu.memory_space<vmem>>, vector<1x32xf32>
    %cst_30 = arith.constant dense<0.000000e+00> : vector<16xf32>
    %130 = vector.multi_reduction <add>, %127, %cst_30 [1] : vector<16x32xf32> to vector<16xf32>
    %131 = vector.shape_cast %130 : vector<16xf32> to vector<16x1xf32>
    %cst_31 = arith.constant 3.200000e+01 : f32
    %132 = vector.broadcast %cst_31 : f32 to vector<16x1xf32>
    %133 = arith.divf %131, %132 : vector<16x1xf32>
    %134 = vector.broadcast %133 : vector<16x1xf32> to vector<16x32xf32>
    %135 = arith.subf %127, %134 : vector<16x32xf32>
    %136 = arith.mulf %135, %135 : vector<16x32xf32>
    %cst_32 = arith.constant dense<0.000000e+00> : vector<16xf32>
    %137 = vector.multi_reduction <add>, %136, %cst_32 [1] : vector<16x32xf32> to vector<16xf32>
    %138 = vector.shape_cast %137 : vector<16xf32> to vector<16x1xf32>
    %cst_33 = arith.constant 3.200000e+01 : f32
    %139 = vector.broadcast %cst_33 : f32 to vector<16x1xf32>
    %140 = arith.divf %138, %139 : vector<16x1xf32>
    %141 = vector.broadcast %133 : vector<16x1xf32> to vector<16x32xf32>
    %142 = arith.subf %127, %141 : vector<16x32xf32>
    %cst_34 = arith.constant 9.99999974E-6 : f32
    %143 = vector.broadcast %cst_34 : f32 to vector<16x1xf32>
    %144 = arith.addf %140, %143 : vector<16x1xf32>
    %145 = math.rsqrt %144 : vector<16x1xf32>
    %146 = vector.broadcast %145 : vector<16x1xf32> to vector<16x32xf32>
    %147 = arith.mulf %142, %146 : vector<16x32xf32>
    %148 = vector.broadcast %128 : vector<1x32xf32> to vector<16x32xf32>
    %149 = arith.mulf %147, %148 : vector<16x32xf32>
    %150 = vector.broadcast %129 : vector<1x32xf32> to vector<16x32xf32>
    %151 = arith.addf %149, %150 : vector<16x32xf32>
    %152 = arith.truncf %151 : vector<16x32xf32> to vector<16x32xbf16>
    %c0_35 = arith.constant 0 : index
    %c0_36 = arith.constant 0 : index
    %153 = vector.load %arg10[%c0_35, %c0_36] : memref<32x64xbf16, #tpu.memory_space<vmem>>, vector<32x64xbf16>
    %cst_37 = arith.constant dense<0.000000e+00> : vector<16x64xf32>
    %154 = tpu.matmul %152, %153, %cst_37 {dimension_numbers = #tpu.dot_dimension_numbers<[1], [0], [0], [1], [0, 0, 1, 1], [], []>} : vector<16x32xbf16>, vector<32x64xbf16>, vector<16x64xf32> -> vector<16x64xf32>
    %c0_38 = arith.constant 0 : index
    %c0_39 = arith.constant 0 : index
    %155 = vector.load %arg11[%c0_38, %c0_39] : memref<1x64xf32, #tpu.memory_space<vmem>>, vector<1x64xf32>
    %156 = vector.broadcast %155 : vector<1x64xf32> to vector<16x64xf32>
    %157 = arith.addf %154, %156 : vector<16x64xf32>
    %cst_40 = arith.constant 0.000000e+00 : f32
    %158 = vector.broadcast %cst_40 : f32 to vector<16x64xf32>
    %159 = arith.maximumf %157, %158 : vector<16x64xf32>
    %cst_41 = arith.constant 0.000000e+00 : f32
    %160 = vector.broadcast %cst_41 : f32 to vector<4x10x64xf32>
    %c0_42 = arith.constant 0 : index
    %c0_43 = arith.constant 0 : index
    %c0_44 = arith.constant 0 : index
    %161 = vector.load %arg15[%c0_42, %c0_43, %c0_44] : memref<4x10x64xf32, #tpu.memory_space<vmem>>, vector<4x10x64xf32>
    tpu.vector_store %arg15[%c0_42, %c0_43, %c0_44], %160 {strides = array<i32>} : memref<4x10x64xf32, #tpu.memory_space<vmem>>, vector<4x10x64xf32>,
    %162 = vector.extract_strided_slice %159 {offsets = [0, 0], sizes = [8, 64], strides = [1, 1]} : vector<16x64xf32> to vector<8x64xf32>
    %c1_45 = arith.constant 1 : index
    %c1_46 = arith.constant 1 : index
    %c0_47 = arith.constant 0 : index
    %163 = vector.load %arg15[%c1_45, %c1_46, %c0_47] : memref<4x10x64xf32, #tpu.memory_space<vmem>>, vector<1x8x64xf32>
    %164 = vector.shape_cast %163 : vector<1x8x64xf32> to vector<8x64xf32>
    %165 = vector.shape_cast %162 : vector<8x64xf32> to vector<1x8x64xf32>
    tpu.vector_store %arg15[%c1_45, %c1_46, %c0_47], %165 {strides = array<i32>} : memref<4x10x64xf32, #tpu.memory_space<vmem>>, vector<1x8x64xf32>,
    %166 = vector.extract_strided_slice %159 {offsets = [8, 0], sizes = [8, 64], strides = [1, 1]} : vector<16x64xf32> to vector<8x64xf32>
    %c2 = arith.constant 2 : index
    %c1_48 = arith.constant 1 : index
    %c0_49 = arith.constant 0 : index
    %167 = vector.load %arg15[%c2, %c1_48, %c0_49] : memref<4x10x64xf32, #tpu.memory_space<vmem>>, vector<1x8x64xf32>
    %168 = vector.shape_cast %167 : vector<1x8x64xf32> to vector<8x64xf32>
    %169 = vector.shape_cast %166 : vector<8x64xf32> to vector<1x8x64xf32>
    tpu.vector_store %arg15[%c2, %c1_48, %c0_49], %169 {strides = array<i32>} : memref<4x10x64xf32, #tpu.memory_space<vmem>>, vector<1x8x64xf32>,
    %c0_50 = arith.constant 0 : index
    %c0_51 = arith.constant 0 : index
    %c0_52 = arith.constant 0 : index
    %170 = vector.load %arg15[%c0_50, %c0_51, %c0_52] : memref<4x10x64xf32, #tpu.memory_space<vmem>>, vector<1x8x64xf32>
    %171 = vector.shape_cast %170 : vector<1x8x64xf32> to vector<8x64xf32>
    %c0_53 = arith.constant 0 : index
    %c1_54 = arith.constant 1 : index
    %c0_55 = arith.constant 0 : index
    %172 = vector.load %arg15[%c0_53, %c1_54, %c0_55] : memref<4x10x64xf32, #tpu.memory_space<vmem>>, vector<1x8x64xf32>
    %173 = vector.shape_cast %172 : vector<1x8x64xf32> to vector<8x64xf32>
    %c0_56 = arith.constant 0 : index
    %c2_57 = arith.constant 2 : index
    %c0_58 = arith.constant 0 : index
    %174 = vector.load %arg15[%c0_56, %c2_57, %c0_58] : memref<4x10x64xf32, #tpu.memory_space<vmem>>, vector<1x8x64xf32>
    %175 = vector.shape_cast %174 : vector<1x8x64xf32> to vector<8x64xf32>
    %c1_59 = arith.constant 1 : index
    %c0_60 = arith.constant 0 : index
    %c0_61 = arith.constant 0 : index
    %176 = vector.load %arg15[%c1_59, %c0_60, %c0_61] : memref<4x10x64xf32, #tpu.memory_space<vmem>>, vector<1x8x64xf32>
    %177 = vector.shape_cast %176 : vector<1x8x64xf32> to vector<8x64xf32>
    %c1_62 = arith.constant 1 : index
    %c1_63 = arith.constant 1 : index
    %c0_64 = arith.constant 0 : index
    %178 = vector.load %arg15[%c1_62, %c1_63, %c0_64] : memref<4x10x64xf32, #tpu.memory_space<vmem>>, vector<1x8x64xf32>
    %179 = vector.shape_cast %178 : vector<1x8x64xf32> to vector<8x64xf32>
    %c1_65 = arith.constant 1 : index
    %c2_66 = arith.constant 2 : index
    %c0_67 = arith.constant 0 : index
    %180 = vector.load %arg15[%c1_65, %c2_66, %c0_67] : memref<4x10x64xf32, #tpu.memory_space<vmem>>, vector<1x8x64xf32>
    %181 = vector.shape_cast %180 : vector<1x8x64xf32> to vector<8x64xf32>
    %c2_68 = arith.constant 2 : index
    %c0_69 = arith.constant 0 : index
    %c0_70 = arith.constant 0 : index
    %182 = vector.load %arg15[%c2_68, %c0_69, %c0_70] : memref<4x10x64xf32, #tpu.memory_space<vmem>>, vector<1x8x64xf32>
    %183 = vector.shape_cast %182 : vector<1x8x64xf32> to vector<8x64xf32>
    %c2_71 = arith.constant 2 : index
    %c1_72 = arith.constant 1 : index
    %c0_73 = arith.constant 0 : index
    %184 = vector.load %arg15[%c2_71, %c1_72, %c0_73] : memref<4x10x64xf32, #tpu.memory_space<vmem>>, vector<1x8x64xf32>
    %185 = vector.shape_cast %184 : vector<1x8x64xf32> to vector<8x64xf32>
    %c2_74 = arith.constant 2 : index
    %c2_75 = arith.constant 2 : index
    %c0_76 = arith.constant 0 : index
    %186 = vector.load %arg15[%c2_74, %c2_75, %c0_76] : memref<4x10x64xf32, #tpu.memory_space<vmem>>, vector<1x8x64xf32>
    %187 = vector.shape_cast %186 : vector<1x8x64xf32> to vector<8x64xf32>
    %188 = tpu.concatenate %171, %173, %175, %177, %179, %181, %183, %185, %187 in 1 : vector<8x64xf32>, vector<8x64xf32>, vector<8x64xf32>, vector<8x64xf32>, vector<8x64xf32>, vector<8x64xf32>, vector<8x64xf32>, vector<8x64xf32>, vector<8x64xf32> -> vector<8x576xf32>
    %189 = arith.truncf %188 : vector<8x576xf32> to vector<8x576xbf16>
    %c0_77 = arith.constant 0 : index
    %c0_78 = arith.constant 0 : index
    %190 = vector.load %arg12[%c0_77, %c0_78] : memref<576x32xbf16, #tpu.memory_space<vmem>>, vector<576x32xbf16>
    %cst_79 = arith.constant dense<0.000000e+00> : vector<8x32xf32>
    %191 = tpu.matmul %189, %190, %cst_79 {dimension_numbers = #tpu.dot_dimension_numbers<[1], [0], [0], [1], [0, 0, 1, 1], [], []>} : vector<8x576xbf16>, vector<576x32xbf16>, vector<8x32xf32> -> vector<8x32xf32>
    %c0_80 = arith.constant 0 : index
    %c0_81 = arith.constant 0 : index
    %192 = vector.load %arg13[%c0_80, %c0_81] : memref<1x32xf32, #tpu.memory_space<vmem>>, vector<1x32xf32>
    %193 = vector.broadcast %192 : vector<1x32xf32> to vector<8x32xf32>
    %194 = arith.addf %191, %193 : vector<8x32xf32>
    %195 = vector.extract_strided_slice %127 {offsets = [0, 0], sizes = [8, 32], strides = [1, 1]} : vector<16x32xf32> to vector<8x32xf32>
    %196 = arith.addf %194, %195 : vector<8x32xf32>
    %c0_82 = arith.constant 0 : index
    %c0_83 = arith.constant 0 : index
    %c0_84 = arith.constant 0 : index
    %197 = vector.load %arg14[%c0_82, %c0_83, %c0_84] : memref<8x2x32xf32, #tpu.memory_space<vmem>>, vector<8x1x32xf32>
    %198 = vector.shape_cast %197 : vector<8x1x32xf32> to vector<8x32xf32>
    %199 = vector.shape_cast %196 : vector<8x32xf32> to vector<8x1x32xf32>
    tpu.vector_store %arg14[%c0_82, %c0_83, %c0_84], %199 {strides = array<i32>} : memref<8x2x32xf32, #tpu.memory_space<vmem>>, vector<8x1x32xf32>,
    %c1_85 = arith.constant 1 : index
    %c0_86 = arith.constant 0 : index
    %c0_87 = arith.constant 0 : index
    %200 = vector.load %arg15[%c1_85, %c0_86, %c0_87] : memref<4x10x64xf32, #tpu.memory_space<vmem>>, vector<1x8x64xf32>
    %201 = vector.shape_cast %200 : vector<1x8x64xf32> to vector<8x64xf32>
    %c1_88 = arith.constant 1 : index
    %c1_89 = arith.constant 1 : index
    %c0_90 = arith.constant 0 : index
    %202 = vector.load %arg15[%c1_88, %c1_89, %c0_90] : memref<4x10x64xf32, #tpu.memory_space<vmem>>, vector<1x8x64xf32>
    %203 = vector.shape_cast %202 : vector<1x8x64xf32> to vector<8x64xf32>
    %c1_91 = arith.constant 1 : index
    %c2_92 = arith.constant 2 : index
    %c0_93 = arith.constant 0 : index
    %204 = vector.load %arg15[%c1_91, %c2_92, %c0_93] : memref<4x10x64xf32, #tpu.memory_space<vmem>>, vector<1x8x64xf32>
    %205 = vector.shape_cast %204 : vector<1x8x64xf32> to vector<8x64xf32>
    %c2_94 = arith.constant 2 : index
    %c0_95 = arith.constant 0 : index
    %c0_96 = arith.constant 0 : index
    %206 = vector.load %arg15[%c2_94, %c0_95, %c0_96] : memref<4x10x64xf32, #tpu.memory_space<vmem>>, vector<1x8x64xf32>
    %207 = vector.shape_cast %206 : vector<1x8x64xf32> to vector<8x64xf32>
    %c2_97 = arith.constant 2 : index
    %c1_98 = arith.constant 1 : index
    %c0_99 = arith.constant 0 : index
    %208 = vector.load %arg15[%c2_97, %c1_98, %c0_99] : memref<4x10x64xf32, #tpu.memory_space<vmem>>, vector<1x8x64xf32>
    %209 = vector.shape_cast %208 : vector<1x8x64xf32> to vector<8x64xf32>
    %c2_100 = arith.constant 2 : index
    %c2_101 = arith.constant 2 : index
    %c0_102 = arith.constant 0 : index
    %210 = vector.load %arg15[%c2_100, %c2_101, %c0_102] : memref<4x10x64xf32, #tpu.memory_space<vmem>>, vector<1x8x64xf32>
    %211 = vector.shape_cast %210 : vector<1x8x64xf32> to vector<8x64xf32>
    %c3 = arith.constant 3 : index
    %c0_103 = arith.constant 0 : index
    %c0_104 = arith.constant 0 : index
    %212 = vector.load %arg15[%c3, %c0_103, %c0_104] : memref<4x10x64xf32, #tpu.memory_space<vmem>>, vector<1x8x64xf32>
    %213 = vector.shape_cast %212 : vector<1x8x64xf32> to vector<8x64xf32>
    %c3_105 = arith.constant 3 : index
    %c1_106 = arith.constant 1 : index
    %c0_107 = arith.constant 0 : index
    %214 = vector.load %arg15[%c3_105, %c1_106, %c0_107] : memref<4x10x64xf32, #tpu.memory_space<vmem>>, vector<1x8x64xf32>
    %215 = vector.shape_cast %214 : vector<1x8x64xf32> to vector<8x64xf32>
    %c3_108 = arith.constant 3 : index
    %c2_109 = arith.constant 2 : index
    %c0_110 = arith.constant 0 : index
    %216 = vector.load %arg15[%c3_108, %c2_109, %c0_110] : memref<4x10x64xf32, #tpu.memory_space<vmem>>, vector<1x8x64xf32>
    %217 = vector.shape_cast %216 : vector<1x8x64xf32> to vector<8x64xf32>
    %218 = tpu.concatenate %201, %203, %205, %207, %209, %211, %213, %215, %217 in 1 : vector<8x64xf32>, vector<8x64xf32>, vector<8x64xf32>, vector<8x64xf32>, vector<8x64xf32>, vector<8x64xf32>, vector<8x64xf32>, vector<8x64xf32>, vector<8x64xf32> -> vector<8x576xf32>
    %219 = arith.truncf %218 : vector<8x576xf32> to vector<8x576xbf16>
    %c0_111 = arith.constant 0 : index
    %c0_112 = arith.constant 0 : index
    %220 = vector.load %arg12[%c0_111, %c0_112] : memref<576x32xbf16, #tpu.memory_space<vmem>>, vector<576x32xbf16>
    %cst_113 = arith.constant dense<0.000000e+00> : vector<8x32xf32>
    %221 = tpu.matmul %219, %220, %cst_113 {dimension_numbers = #tpu.dot_dimension_numbers<[1], [0], [0], [1], [0, 0, 1, 1], [], []>} : vector<8x576xbf16>, vector<576x32xbf16>, vector<8x32xf32> -> vector<8x32xf32>
    %c0_114 = arith.constant 0 : index
    %c0_115 = arith.constant 0 : index
    %222 = vector.load %arg13[%c0_114, %c0_115] : memref<1x32xf32, #tpu.memory_space<vmem>>, vector<1x32xf32>
    %223 = vector.broadcast %222 : vector<1x32xf32> to vector<8x32xf32>
    %224 = arith.addf %221, %223 : vector<8x32xf32>
    %225 = vector.extract_strided_slice %127 {offsets = [8, 0], sizes = [8, 32], strides = [1, 1]} : vector<16x32xf32> to vector<8x32xf32>
    %226 = arith.addf %224, %225 : vector<8x32xf32>
    %c0_116 = arith.constant 0 : index
    %c1_117 = arith.constant 1 : index
    %c0_118 = arith.constant 0 : index
    %227 = vector.load %arg14[%c0_116, %c1_117, %c0_118] : memref<8x2x32xf32, #tpu.memory_space<vmem>>, vector<8x1x32xf32>
    %228 = vector.shape_cast %227 : vector<8x1x32xf32> to vector<8x32xf32>
    %229 = vector.shape_cast %226 : vector<8x32xf32> to vector<8x1x32xf32>
    tpu.vector_store %arg14[%c0_116, %c1_117, %c0_118], %229 {strides = array<i32>} : memref<8x2x32xf32, #tpu.memory_space<vmem>>, vector<8x1x32xf32>,
    return
  }
  func.func @transform_0(%arg0: i32) -> (i32, i32, i32) {
    %c0_i32 = arith.constant 0 : i32
    %c0_i32_0 = arith.constant 0 : i32
    %c0_i32_1 = arith.constant 0 : i32
    %c0_i32_2 = arith.constant 0 : i32
    return %c0_i32, %c0_i32_0, %c0_i32_1 : i32, i32, i32
  }
  func.func @transform_1(%arg0: i32) -> (i32, i32) {
    %c0_i32 = arith.constant 0 : i32
    %c0_i32_0 = arith.constant 0 : i32
    %c0_i32_1 = arith.constant 0 : i32
    return %c0_i32, %c0_i32_0 : i32, i32
  }
  func.func @transform_2(%arg0: i32) -> (i32, i32) {
    %c0_i32 = arith.constant 0 : i32
    %c0_i32_0 = arith.constant 0 : i32
    %c0_i32_1 = arith.constant 0 : i32
    return %c0_i32, %c0_i32_0 : i32, i32
  }
  func.func @transform_3(%arg0: i32) -> (i32, i32) {
    %c0_i32 = arith.constant 0 : i32
    %c0_i32_0 = arith.constant 0 : i32
    %c0_i32_1 = arith.constant 0 : i32
    return %c0_i32, %c0_i32_0 : i32, i32
  }
  func.func @transform_4(%arg0: i32) -> (i32, i32) {
    %c0_i32 = arith.constant 0 : i32
    %c0_i32_0 = arith.constant 0 : i32
    %c0_i32_1 = arith.constant 0 : i32
    return %c0_i32, %c0_i32_0 : i32, i32
  }
  func.func @transform_5(%arg0: i32) -> (i32, i32) {
    %c0_i32 = arith.constant 0 : i32
    %c0_i32_0 = arith.constant 0 : i32
    %c0_i32_1 = arith.constant 0 : i32
    return %c0_i32, %c0_i32_0 : i32, i32
  }
  func.func @transform_6(%arg0: i32) -> (i32, i32) {
    %c0_i32 = arith.constant 0 : i32
    %c0_i32_0 = arith.constant 0 : i32
    %c0_i32_1 = arith.constant 0 : i32
    return %c0_i32, %c0_i32_0 : i32, i32
  }
  func.func @transform_7(%arg0: i32) -> (i32, i32) {
    %c0_i32 = arith.constant 0 : i32
    %c0_i32_0 = arith.constant 0 : i32
    %c0_i32_1 = arith.constant 0 : i32
    return %c0_i32, %c0_i32_0 : i32, i32
  }
  func.func @transform_8(%arg0: i32) -> (i32, i32) {
    %c0_i32 = arith.constant 0 : i32
    %c0_i32_0 = arith.constant 0 : i32
    %c0_i32_1 = arith.constant 0 : i32
    return %c0_i32, %c0_i32_0 : i32, i32
  }
  func.func @transform_9(%arg0: i32) -> (i32, i32) {
    %c0_i32 = arith.constant 0 : i32
    %c0_i32_0 = arith.constant 0 : i32
    %c0_i32_1 = arith.constant 0 : i32
    return %c0_i32, %c0_i32_0 : i32, i32
  }
  func.func @transform_10(%arg0: i32) -> (i32, i32) {
    %c0_i32 = arith.constant 0 : i32
    %c0_i32_0 = arith.constant 0 : i32
    %c0_i32_1 = arith.constant 0 : i32
    return %c0_i32, %c0_i32_0 : i32, i32
  }
  func.func @transform_11(%arg0: i32) -> (i32, i32) {
    %c0_i32 = arith.constant 0 : i32
    %c0_i32_0 = arith.constant 0 : i32
    %c0_i32_1 = arith.constant 0 : i32
    return %c0_i32, %c0_i32_0 : i32, i32
  }
  func.func @transform_12(%arg0: i32) -> (i32, i32) {
    %c0_i32 = arith.constant 0 : i32
    %c0_i32_0 = arith.constant 0 : i32
    %c0_i32_1 = arith.constant 0 : i32
    return %c0_i32, %c0_i32_0 : i32, i32
  }
  func.func @transform_13(%arg0: i32) -> (i32, i32, i32) {
    %c0_i32 = arith.constant 0 : i32
    %c0_i32_0 = arith.constant 0 : i32
    %c0_i32_1 = arith.constant 0 : i32
    %c0_i32_2 = arith.constant 0 : i32
    return %c0_i32, %c0_i32_0, %c0_i32_1 : i32, i32, i32
  }
}

</mosaic_0001>

<bundles_post_ra>
// kernel: tpu_custom_call.1
= control target key start
LH: loop header
LB: loop body
LE: loop exit
PB: predicated region body
PF: predicated region fallthrough
CT: control target
= control target key end

     0   :  { %vm71_vm0 = vcmask 1041409   ;;  %vm74_vm1 = vcmask 1042434   ;;  %vm77_vm2 = vcmask 1043459   ;;  %vm80_vm3 = vcmask 1044484   ;;  %s3722_s0 = inlined_call_operand.vmem [shape: f32[8,2,32], index: 0, kind: input, shape index: {}]   ;;  %s3723_s1 = inlined_call_operand.vmem [shape: f32[1,32], index: 1, kind: input, shape index: {}]   ;;  %s3724_s2 = inlined_call_operand.vmem [shape: f32[1,32], index: 2, kind: input, shape index: {}]   ;;  %s3725_s3 = inlined_call_operand.vmem [shape: bf16[32,96], index: 3, kind: input, shape index: {}]   ;;  %s3726_s4 = inlined_call_operand.vmem [shape: f32[1,96], index: 4, kind: input, shape index: {}]   ;;  %s3727_s5 = inlined_call_operand.vmem [shape: bf16[32,32], index: 5, kind: input, shape index: {}]   ;;  %s3728_s6 = inlined_call_operand.vmem [shape: f32[1,32], index: 6, kind: input, shape index: {}]   ;;  %s3729_s7 = inlined_call_operand.vmem [shape: f32[1,32], index: 7, kind: input, shape index: {}]   ;;  %s3730_s8 = inlined_call_operand.vmem [shape: f32[1,32], index: 8, kind: input, shape index: {}]   ;;  %s3731_s9 = inlined_call_operand.vmem [shape: bf16[32,64], index: 9, kind: input, shape index: {}]   ;;  %s3732_s10 = inlined_call_operand.vmem [shape: f32[1,64], index: 10, kind: input, shape index: {}]   ;;  %s3733_s11 = inlined_call_operand.vmem [shape: bf16[576,32], index: 11, kind: input, shape index: {}]   ;;  %s3734_s12 = inlined_call_operand.vmem [shape: f32[1,32], index: 12, kind: input, shape index: {}]   ;;  %s3735_s13 = inlined_call_operand.hbm [shape: f32[8,2,32], index: 13, kind: output, shape index: {}]  }
   0x1   :  { %v46_v0 = vld [vmem:[%s3722_s0] sm:$0x1]  ;;  %v47_v1 = vld [vmem:[%s3722_s0 + $0x2] sm:$0x1]  ;;  %v48_v2 = vld [vmem:[%s3722_s0 + $0x4] sm:$0x1] }
   0x2   :  { %v49_v3 = vld [vmem:[%s3722_s0 + $0x6] sm:$0x1]  ;;  %v50_v4 = vld [vmem:[%s3722_s0 + $0x8] sm:$0x1]  ;;  %v51_v5 = vld [vmem:[%s3722_s0 + $0xa] sm:$0x1] }
   0x3   :  { %v52_v6 = vld [vmem:[%s3722_s0 + $0xc] sm:$0x1]  ;;  %v70_v7 = vrot.slane %v47_v1, 7  ;;  %v53_v8 = vld [vmem:[%s3722_s0 + $0xe] sm:$0x1]  ;;  %v73_v9 = vrot.slane %v48_v2, 6 }
   0x4   :  { %v76_v10 = vrot.slane %v49_v3, 5  ;;  %v79_v12 = vrot.slane %v50_v4, 4  ;;  %v82_v13 = vrot.slane %v51_v5, 3  ;;  %v55_v14 = vld [vmem:[%s3722_s0 + $0x3] sm:$0x1]  ;;  %vm83_vm4 = vcmask 1045509  }
   0x5   :  { %v72_v11 = vsel %vm71_vm0, %v70_v7, %v46_v0  ;;  %v85_v16 = vrot.slane %v52_v6, 2  ;;  %vm86_vm5 = vcmask 1046534   ;;  %v54_v17 = vld [vmem:[%s3722_s0 + $0x1] sm:$0x1]  ;;  %v56_v18 = vld [vmem:[%s3722_s0 + $0x5] sm:$0x1] }
   0x6   :  { %v75_v15 = vsel %vm74_vm1, %v73_v9, %v72_v11  ;;  %v88_v20 = vrot.slane %v53_v8, 1  ;;  %vm89_vm6 = vcmask 1047559   ;;  %vm117_vm7 = vcmask 261120   ;;  %v57_v21 = vld [vmem:[%s3722_s0 + $0x7] sm:$0x1] }
   0x7   :  { %v78_v19 = vsel %vm77_vm2, %v76_v10, %v75_v15  ;;  %v58_v23 = vld [vmem:[%s3722_s0 + $0x9] sm:$0x1]  ;;  %v59_v24 = vld [vmem:[%s3722_s0 + $0xb] sm:$0x1]  ;;  %v60_v25 = vld [vmem:[%s3722_s0 + $0xd] sm:$0x1] }
   0x8   :  { %v81_v22 = vsel %vm80_vm3, %v79_v12, %v78_v19  ;;  %v61_v27 = vld [vmem:[%s3722_s0 + $0xf] sm:$0x1]  ;;  %v100_v28 = vrot.slane %v55_v14, 7  ;;  %v102_v29 = vrot.slane %v56_v18, 6  ;;  %v104_v30 = vrot.slane %v57_v21, 5 }
   0x9   :  { %v84_v26 = vsel %vm83_vm4, %v82_v13, %v81_v22  ;;  %v106_v32 = vrot.slane %v58_v23, 4  ;;  %v108_v35 = vrot.slane %v59_v24, 3  ;;  %v110_v36 = vrot.slane %v60_v25, 2 }
   0xa   :  { %v87_v31 = vsel %vm86_vm5, %v85_v16, %v84_v26  ;;  %v101_v34 = vsel %vm71_vm0, %v100_v28, %v54_v17  ;;  %v112_v39 = vrot.slane %v61_v27, 1 }
   0xb   :  { %v3136_v33 = vsel %vm89_vm6, %v88_v20, %v87_v31  ;;  %v103_v38 = vsel %vm74_vm1, %v102_v29, %v101_v34 }
   0xc   :  { %v118_v37 = vsel %vm117_vm7, %v3136_v33, 0.0  ;;  %v105_v40 = vsel %vm77_vm2, %v104_v30, %v103_v38 }
   0xd   :  { %119 = vadd.xlane.f32.xlu0 %v118_v37  ;;  %v107_v41 = vsel %vm80_vm3, %v106_v32, %v105_v40 }
   0xe   :  { %v109_v42 = vsel %vm83_vm4, %v108_v35, %v107_v41 }
   0xf   :  { %v111_v43 = vsel %vm86_vm5, %v110_v36, %v109_v42 }
  0x10   :  { %v3147_v44 = vsel %vm89_vm6, %v112_v39, %v111_v43 }
  0x11   :  { %v121_v45 = vsel %vm117_vm7, %v3147_v44, 0.0 }
  0x12   :  { %122 = vadd.xlane.f32.xlu0 %v121_v45 }
  0x13   :  { %18 = vsyncpa [#allocation4], 0  ;;  %v2857_v56 = vld [vmem:[%s3725_s3 + $0x8] sm:$0xff]   ;;  %v2997_v57 = vmov 0.0   ;;  %vm2998_vm8 = vmmov 0   ;;  %v2858_v58 = vld [vmem:[%s3725_s3] sm:$0xff]  }
  0x14   :  { %2664 = vmatprep.subr.bf16.mxu0 %v2997_v57  ;;  %2668 = vmatprep.mubr.msk.bf16.mxu0 %vm2998_vm8, %v2997_v57  ;;  %v2417_v3 = vld [vmem:[%s3723_s1] ss:$0 sm:$0xff]  ;;  %s2999_s1 = smov 112   ;;  %s3000_s14 = smov 120   ;;  %vm260_vm9 = vcmask 64512   ;;  %vm751_vm10 = vcmask 1043456  }
  0x15   :  { %2665 = vmatpush3.bf16.msra.mxu0 %v2857_v56  ;;  %2672 = vmatprep.subr.bf16.mxu1 %v2997_v57  ;;  %v2418_v7 = vld [vmem:[%s3724_s2] ss:$0 sm:$0xff]  ;;  %s3001_s2 = smov 104   ;;  %s3002_s15 = smov 96   ;;  %vm1144_vm11 = vcmask 130048   ;;  %vm1146_vm12 = vcmask 195584  }
  0x16   :  { %2666 = vmatprep.subr.bf16.mxu0 %v2997_v57  ;;  %2674 = vmatprep.mubr.msk.bf16.mxu1 %vm2998_vm8, %v2997_v57  ;;  %v2419_v12 = vld [vmem:[%s3726_s4] ss:$0 sm:$0xff]  ;;  %s3003_s4 = smov 64   ;;  %s3004_s18 = smov 16   ;;  %vm1347_vm13 = vcmask 523264   ;;  %vm1349_vm14 = vcmask 517120  }
  0x17   :  { %s3005_s19 = smov 8   ;;  %s3006_s22 = smov 24   ;;  %1350 = vst.msk [vmem:[#allocation2 + $0x8] sm:$0x3] %vm1349_vm14, %v2997_v57  ;;  %1352 = vst.msk [vmem:[#allocation2 + $0x18] sm:$0x3] %vm1349_vm14, %v2997_v57 }
  0x18   :  { %1351 = vst.msk [vmem:[#allocation2 + $0x10] sm:$0xff] %vm1347_vm13, %v2997_v57  ;;  %1348 = vst.msk [vmem:[#allocation2] sm:$0xff] %vm1347_vm13, %v2997_v57  ;;  %vm1872_vm15 = vcmask 253952  }
  0x19   :  { %2667 = vmatpush3.bf16.msra.mxu0 %v2858_v58  ;;  %1356 = vst.msk [vmem:[#allocation2 + $0x38] sm:$0x3] %vm1349_vm14, %v2997_v57  ;;  %1354 = vst.msk [vmem:[#allocation2 + $0x28] sm:$0x3] %vm1349_vm14, %v2997_v57 }
  0x1a   :  { %2678 = vmatprep.subr.bf16.mxu0 %v2997_v57  ;;  %1353 = vst.msk [vmem:[#allocation2 + $0x20] sm:$0xff] %vm1347_vm13, %v2997_v57  ;;  %1355 = vst.msk [vmem:[#allocation2 + $0x30] sm:$0xff] %vm1347_vm13, %v2997_v57 }
  0x96   :  { %v120_v46 = vpop.xlane.xlu0 %119 }
  0x97   :  { %v125_v47 = vmul.f32 0.03125, %v120_v46 }
  0x99   :  { %v127_v48 = vsub.f32 %v3136_v33, %v125_v47 }
  0x9b   :  { %v129_v49 = vmul.f32 %v127_v48, %v127_v48  ;;  %v123_v50 = vpop.xlane.xlu0 %122 }
  0x9c   :  { %v126_v51 = vmul.f32 0.03125, %v123_v50 }
  0x9d   :  { %v131_v52 = vsel %vm117_vm7, %v129_v49, 0.0 }
  0x9e   :  { %132 = vadd.xlane.f32.xlu1 %v131_v52  ;;  %v128_v53 = vsub.f32 %v3147_v44, %v126_v51 }
  0xa0   :  { %v130_v54 = vmul.f32 %v128_v53, %v128_v53 }
  0xa2   :  { %v134_v55 = vsel %vm117_vm7, %v130_v54, 0.0 }
  0xa3   :  { %135 = vadd.xlane.f32.xlu1 %v134_v55 }
 0x127   :  { %v133_v59 = vpop.xlane.xlu1 %132 }
 0x128   :  { %v137_v60 = vmul.f32 0.03125, %v133_v59 }
 0x12a   :  { %v139_v61 = vadd.f32 1e-05, %v137_v60 }
 0x12c   :  { %2935 = vrsqrt.f32 %v139_v61  ;;  %v136_v62 = vpop.xlane.xlu1 %135 }
 0x12d   :  { %v138_v63 = vmul.f32 0.03125, %v136_v62 }
 0x12f   :  { %v140_v0 = vadd.f32 1e-05, %v138_v63 }
 0x131   :  { %2937 = vrsqrt.f32 %v140_v0 }
 0x139   :  { %v2936_v1 = vpop.eup %2935 }
 0x13a   :  { %v143_v2 = vmul.f32 %v2936_v1, %v127_v48 }
 0x13c   :  { %v151_v6 = vmul.f32 %v2417_v3, %v143_v2 }
 0x13e   :  { %v2938_v4 = vpop.eup %2937  ;;  %v159_v9 = vadd.f32 %v2418_v7, %v151_v6 }
 0x13f   :  { %v144_v5 = vmul.f32 %v2938_v4, %v128_v53 }
 0x141   :  { %v152_v8 = vmul.f32 %v2417_v3, %v144_v5 }
 0x143   :  { %v160_v10 = vadd.f32 %v2418_v7, %v152_v8 }
 0x145   :  { %v161_v11 = vpack.c.bf16 %v160_v10, %v159_v9 }
 0x147   :  { %2669 = vmatmul.mubr.msk.bf16.vlgmr.msra.gmra.mxu0 %vm117_vm7, %v161_v11 }
 0x148   :  { %2680 = vmatprep.mubr.msk.bf16.mxu0 %vm2998_vm8, %v2997_v57 }
 0x207   :  { %v222_v13 = vpop.f32.mrf.mxu0 }
 0x208   :  { %v223_v14 = vadd.f32 %v2419_v12, %v222_v13 }
 0x209   :  { %v2670_v15 = vpop.f32.mrf.mxu0 }
 0x20a   :  { %233 = vrot.lane.b32.xlu1 %v223_v14, %s2999_s1  ;;  %230 = vrot.lane.b32.xlu0 %v223_v14, %s3000_s14  ;;  %v3181_v19 = vpack.c.bf16 %v223_v14, %v223_v14 }
 0x20b   :  { %v225_v16 = vpop.f32.mrf.mxu0 }
 0x20c   :  { %v226_v17 = vadd.f32 %v2419_v12, %v225_v16 }
 0x20d   :  { %v2671_v18 = vpop.f32.mrf.mxu0 }
 0x20e   :  { %236 = vrot.lane.b32.xlu1 %v223_v14, %s3001_s2  ;;  %243 = vrot.lane.b32.xlu0 %v226_v17, %s2999_s1  ;;  %v3192_v27 = vpack.c.bf16 %v226_v17, %v226_v17 }
 0x212   :  { %258 = vrot.lane.b32.xlu0 %v3181_v19, %s3002_s15  ;;  %240 = vrot.lane.b32.xlu1 %v226_v17, %s3000_s14 }
 0x216   :  { %246 = vrot.lane.b32.xlu1 %v226_v17, %s3001_s2 }
 0x27c   :  { %v234_v20 = vpop.permute.xlu1 %233  ;;  %v231_v21 = vpop.permute.xlu0 %230 }
 0x27d   :  { %v3184_v22 = vpack.c.bf16 %v234_v20, %v234_v20  ;;  %v3186_v23 = vpack.c.bf16 %v231_v21, %v231_v21 }
 0x27f   :  { %357 = vrot.lane.b32.xlu0 %v3184_v22, %s3002_s15  ;;  %308 = vrot.lane.b32.xlu1 %v3186_v23, %s3002_s15 }
 0x280   :  { %v237_v24 = vpop.permute.xlu1 %236  ;;  %v244_v25 = vpop.permute.xlu0 %243 }
 0x281   :  { %v3190_v26 = vpack.c.bf16 %v237_v24, %v237_v24  ;;  %v3196_v30 = vpack.c.bf16 %v244_v25, %v244_v25 }
 0x283   :  { %406 = vrot.lane.b32.xlu1 %v3190_v26, %s3002_s15  ;;  %455 = vrot.lane.b32.xlu0 %v3192_v27, %s3002_s15 }
 0x284   :  { %v259_v28 = vpop.permute.xlu0 %258  ;;  %v241_v29 = vpop.permute.xlu1 %240 }
 0x285   :  { %v3198_v31 = vpack.c.bf16 %v241_v29, %v241_v29  ;;  %v265_v32 = vsel %vm260_vm9, %v259_v28, 0 }
 0x286   :  { %2673 = vmatpush3.bf16.xpose.msra.mxu1 %v265_v32 }
 0x287   :  { %504 = vrot.lane.b32.xlu1 %v3198_v31, %s3002_s15  ;;  %553 = vrot.lane.b32.xlu0 %v3196_v30, %s3002_s15 }
 0x288   :  { %v247_v34 = vpop.permute.xlu1 %246  ;;  %2684 = vmatprep.subr.bf16.mxu1 %v2997_v57 }
 0x289   :  { %v3204_v35 = vpack.c.bf16 %v247_v34, %v247_v34 }
 0x28b   :  { %602 = vrot.lane.b32.xlu1 %v3204_v35, %s3002_s15 }
 0x28d   :  { %2675 = vmatmul.mubr.msk.bf16.vlgmr.msra.gmra.mxu1 %vm260_vm9, %v3181_v19 }
 0x28e   :  { %2686 = vmatprep.mubr.msk.bf16.mxu1 %vm2998_vm8, %v2997_v57 }
 0x2f1   :  { %v358_v36 = vpop.permute.xlu0 %357  ;;  %v309_v37 = vpop.permute.xlu1 %308 }
 0x2f2   :  { %v363_v38 = vsel %vm260_vm9, %v358_v36, 0  ;;  %v314_v39 = vsel %vm260_vm9, %v309_v37, 0 }
 0x2f3   :  { %2679 = vmatpush3.bf16.xpose.msra.mxu0 %v314_v39  ;;  %2685 = vmatpush3.bf16.xpose.msra.mxu1 %v363_v38 }
 0x2f4   :  { %2690 = vmatprep.subr.bf16.mxu0 %v2997_v57  ;;  %2696 = vmatprep.subr.bf16.mxu1 %v2997_v57 }
 0x2f5   :  { %v407_v40 = vpop.permute.xlu1 %406  ;;  %v456_v41 = vpop.permute.xlu0 %455 }
 0x2f6   :  { %v412_v42 = vsel %vm260_vm9, %v407_v40, 0  ;;  %v461_v43 = vsel %vm260_vm9, %v456_v41, 0 }
 0x2f9   :  { %v505_v45 = vpop.permute.xlu1 %504  ;;  %v554_v46 = vpop.permute.xlu0 %553 }
 0x2fa   :  { %2681 = vmatmul.mubr.msk.bf16.vlgmr.msra.gmra.mxu0 %vm260_vm9, %v3186_v23  ;;  %2687 = vmatmul.mubr.msk.bf16.vlgmr.msra.gmra.mxu1 %vm260_vm9, %v3184_v22  ;;  %v510_v47 = vsel %vm260_vm9, %v505_v45, 0  ;;  %v559_v48 = vsel %vm260_vm9, %v554_v46, 0 }
 0x2fb   :  { %2691 = vmatpush3.bf16.xpose.msra.mxu0 %v412_v42  ;;  %2697 = vmatpush3.bf16.xpose.msra.mxu1 %v461_v43 }
 0x2fc   :  { %2692 = vmatprep.mubr.msk.bf16.mxu0 %vm2998_vm8, %v2997_v57  ;;  %2698 = vmatprep.mubr.msk.bf16.mxu1 %vm2998_vm8, %v2997_v57 }
 0x2fd   :  { %2702 = vmatprep.subr.bf16.mxu0 %v2997_v57  ;;  %2708 = vmatprep.subr.bf16.mxu1 %v2997_v57  ;;  %v603_v49 = vpop.permute.xlu1 %602 }
 0x2fe   :  { %v608_v50 = vsel %vm260_vm9, %v603_v49, 0 }
 0x302   :  { %2693 = vmatmul.mubr.msk.bf16.vlgmr.msra.gmra.mxu0 %vm260_vm9, %v3190_v26  ;;  %2699 = vmatmul.mubr.msk.bf16.vlgmr.msra.gmra.mxu1 %vm260_vm9, %v3192_v27 }
 0x303   :  { %2703 = vmatpush3.bf16.xpose.msra.mxu0 %v510_v47  ;;  %2709 = vmatpush3.bf16.xpose.msra.mxu1 %v559_v48 }
 0x304   :  { %2704 = vmatprep.mubr.msk.bf16.mxu0 %vm2998_vm8, %v2997_v57  ;;  %2710 = vmatprep.mubr.msk.bf16.mxu1 %vm2998_vm8, %v2997_v57 }
 0x305   :  { %2714 = vmatprep.subr.bf16.mxu0 %v2997_v57  ;;  %2720 = vmatprep.subr.bf16.mxu1 %v2997_v57 }
 0x30a   :  { %2705 = vmatmul.mubr.msk.bf16.vlgmr.msra.gmra.mxu0 %vm260_vm9, %v3198_v31  ;;  %2711 = vmatmul.mubr.msk.bf16.vlgmr.msra.gmra.mxu1 %vm260_vm9, %v3196_v30 }
 0x30b   :  { %2715 = vmatpush3.bf16.xpose.msra.mxu0 %v608_v50  ;;  %2716 = vmatprep.mubr.msk.bf16.mxu0 %vm2998_vm8, %v2997_v57 }
 0x30c   :  { %2726 = vmatprep.subr.bf16.mxu0 %v2997_v57  ;;  %2722 = vmatprep.mubr.msk.bf16.mxu1 %vm2998_vm8, %v2997_v57 }
 0x312   :  { %2717 = vmatmul.mubr.msk.bf16.vlgmr.msra.gmra.mxu0 %vm260_vm9, %v3204_v35 }
 0x313   :  { %2728 = vmatprep.mubr.msk.bf16.mxu0 %vm2998_vm8, %v2997_v57 }
 0x34d   :  { %v301_v51 = vpop.f32.mrf.mxu1 }
 0x34e   :  { %v650_v52 = vsel %vm260_vm9, %v301_v51, -inf }
 0x34f   :  { %v2676_v53 = vpop.f32.mrf.mxu1  ;;  %651 = vmax.xlane.f32.xlu0 %v650_v52 }
 0x351   :  { %v304_v54 = vpop.f32.mrf.mxu1 }
 0x353   :  { %v2677_v55 = vpop.f32.mrf.mxu1 }
 0x3ba   :  { %v350_v56 = vpop.f32.mrf.mxu0  ;;  %v399_v58 = vpop.f32.mrf.mxu1 }
 0x3bb   :  { %v656_v59 = vsel %vm260_vm9, %v399_v58, -inf  ;;  %v653_v60 = vsel %vm260_vm9, %v350_v56, -inf }
 0x3bc   :  { %v2688_v61 = vpop.f32.mrf.mxu1  ;;  %657 = vmax.xlane.f32.xlu0 %v656_v59  ;;  %654 = vmax.xlane.f32.xlu1 %v653_v60  ;;  %v2682_v62 = vpop.f32.mrf.mxu0 }
 0x3be   :  { %v353_v63 = vpop.f32.mrf.mxu0  ;;  %v402_v0 = vpop.f32.mrf.mxu1 }
 0x3c0   :  { %v2683_v1 = vpop.f32.mrf.mxu0  ;;  %v2689_v2 = vpop.f32.mrf.mxu1 }
 0x3c2   :  { %v3256_v3 = vpop.f32.mrf.mxu0  ;;  %v3258_v4 = vpop.f32.mrf.mxu1 }
 0x3c3   :  { %v659_v5 = vsel %vm260_vm9, %v3256_v3, -inf  ;;  %v662_v10 = vsel %vm260_vm9, %v3258_v4, -inf }
 0x3c4   :  { %v2700_v6 = vpop.f32.mrf.mxu1  ;;  %660 = vmax.xlane.f32.xlu0 %v659_v5  ;;  %v2694_v7 = vpop.f32.mrf.mxu0 }
 0x3c6   :  { %v451_v8 = vpop.f32.mrf.mxu0  ;;  %v500_v9 = vpop.f32.mrf.mxu1 }
 0x3c8   :  { %v2701_v11 = vpop.f32.mrf.mxu1  ;;  %663 = vmax.xlane.f32.xlu0 %v662_v10  ;;  %v2695_v12 = vpop.f32.mrf.mxu0 }
 0x3ca   :  { %v3264_v13 = vpop.f32.mrf.mxu0  ;;  %v3266_v14 = vpop.f32.mrf.mxu1 }
 0x3cb   :  { %v668_v15 = vsel %vm260_vm9, %v3266_v14, -inf  ;;  %v665_v16 = vsel %vm260_vm9, %v3264_v13, -inf }
 0x3cc   :  { %v2712_v17 = vpop.f32.mrf.mxu1  ;;  %669 = vmax.xlane.f32.xlu0 %v668_v15  ;;  %666 = vmax.xlane.f32.xlu1 %v665_v16  ;;  %v2706_v18 = vpop.f32.mrf.mxu0 }
 0x3ce   :  { %v549_v20 = vpop.f32.mrf.mxu0  ;;  %v598_v21 = vpop.f32.mrf.mxu1 }
 0x3d0   :  { %v2707_v24 = vpop.f32.mrf.mxu0  ;;  %v2713_v25 = vpop.f32.mrf.mxu1 }
 0x3d2   :  { %v3272_v28 = vpop.f32.mrf.mxu0 }
 0x3d3   :  { %v671_v41 = vsel %vm260_vm9, %v3272_v28, -inf }
 0x3d4   :  { %v2718_v29 = vpop.f32.mrf.mxu0 }
 0x3d6   :  { %v647_v32 = vpop.f32.mrf.mxu0 }
 0x3d8   :  { %v2719_v34 = vpop.f32.mrf.mxu0  ;;  %v652_v36 = vpop.xlane.xlu0 %651 }
 0x3d9   :  { %v674_v37 = vsub.f32 %v301_v51, %v652_v36 }
 0x3db   :  { %v682_v38 = vmul.f32 1.442695, %v674_v37 }
 0x3dd   :  { %795 = vrot.lane.b32.xlu1 %v3186_v23, %s3003_s4  ;;  %2939 = vpow2.f32 %v682_v38 }
 0x3e1   :  { %843 = vrot.lane.b32.xlu1 %v3184_v22, %s3003_s4 }
 0x3e2   :  { %746 = vrot.lane.b32.xlu0 %v3181_v19, %s3003_s4 }
 0x3ea   :  { %v3280_v39 = vpop.eup %2939 }
 0x3eb   :  { %v698_v40 = vsel %vm260_vm9, %v3280_v39, 0.0 }
 0x401   :  { %699 = vadd.xlane.f32.xlu0 %v698_v40 }
 0x405   :  { %672 = vmax.xlane.f32.xlu1 %v671_v41 }
 0x416   :  { %891 = vrot.lane.b32.xlu1 %v3190_v26, %s3003_s4 }
 0x445   :  { %v658_v22 = vpop.xlane.xlu0 %657  ;;  %v655_v23 = vpop.xlane.xlu1 %654 }
 0x446   :  { %v676_v19 = vsub.f32 %v399_v58, %v658_v22  ;;  %v675_v42 = vsub.f32 %v350_v56, %v655_v23 }
 0x448   :  { %v686_v43 = vmul.f32 1.442695, %v676_v19  ;;  %v684_v45 = vmul.f32 1.442695, %v675_v42 }
 0x44a   :  { %2941 = vpow2.f32 %v686_v43 }
 0x44b   :  { %2943 = vpow2.f32 %v684_v45 }
 0x44d   :  { %v661_v46 = vpop.xlane.xlu0 %660 }
 0x44e   :  { %v677_v59 = vsub.f32 %v3256_v3, %v661_v46 }
 0x450   :  { %v688_v62 = vmul.f32 1.442695, %v677_v59 }
 0x451   :  { %v664_v47 = vpop.xlane.xlu0 %663 }
 0x452   :  { %v678_v58 = vsub.f32 %v3258_v4, %v664_v47 }
 0x454   :  { %v690_v60 = vmul.f32 1.442695, %v678_v58 }
 0x455   :  { %v670_v48 = vpop.xlane.xlu0 %669  ;;  %v667_v49 = vpop.xlane.xlu1 %666 }
 0x456   :  { %v680_v61 = vsub.f32 %v3266_v14, %v670_v48  ;;  %v679_v63 = vsub.f32 %v3264_v13, %v667_v49  ;;  %2945 = vpow2.f32 %v690_v60 }
 0x457   :  { %v3288_v50 = vpop.eup %2941  ;;  %2947 = vpow2.f32 %v688_v62 }
 0x458   :  { %v3290_v51 = vpop.eup %2943  ;;  %v704_v26 = vsel %vm260_vm9, %v3288_v50, 0.0  ;;  %v694_v0 = vmul.f32 1.442695, %v680_v61  ;;  %v692_v1 = vmul.f32 1.442695, %v679_v63 }
 0x459   :  { %705 = vadd.xlane.f32.xlu0 %v704_v26  ;;  %v747_v52 = vpop.permute.xlu0 %746  ;;  %v796_v53 = vpop.permute.xlu1 %795  ;;  %v701_v54 = vsel %vm260_vm9, %v3290_v51, 0.0 }
 0x45a   :  { %v753_v55 = vsel %vm751_vm10, %v747_v52, 0  ;;  %v801_v56 = vsel %vm751_vm10, %v796_v53, 0  ;;  %702 = vadd.xlane.f32.xlu1 %v701_v54  ;;  %2949 = vpow2.f32 %v694_v0 }
 0x45b   :  { %2721 = vmatpush3.bf16.msra.mxu1 %v753_v55  ;;  %2727 = vmatpush3.bf16.msra.mxu0 %v801_v56  ;;  %2951 = vpow2.f32 %v692_v1 }
 0x45c   :  { %2732 = vmatprep.subr.bf16.mxu1 %v2997_v57  ;;  %2738 = vmatprep.subr.bf16.mxu0 %v2997_v57 }
 0x45d   :  { %v844_v2 = vpop.permute.xlu1 %843 }
 0x45e   :  { %v849_v16 = vsel %vm751_vm10, %v844_v2, 0 }
 0x46b   :  { %987 = vrot.lane.b32.xlu1 %v3198_v31, %s3003_s4  ;;  %v3308_v31 = vpop.eup %2945 }
 0x46c   :  { %v3310_v5 = vpop.eup %2947  ;;  %v710_v3 = vsel %vm260_vm9, %v3308_v31, 0.0 }
 0x46d   :  { %v3314_v4 = vpop.eup %2949  ;;  %v707_v6 = vsel %vm260_vm9, %v3310_v5, 0.0 }
 0x46e   :  { %v3318_v8 = vpop.eup %2951  ;;  %v716_v11 = vsel %vm260_vm9, %v3314_v4, 0.0 }
 0x46f   :  { %939 = vrot.lane.b32.xlu0 %v3192_v27, %s3003_s4  ;;  %v713_v12 = vsel %vm260_vm9, %v3318_v8, 0.0 }
 0x48a   :  { %v700_v27 = vpop.xlane.xlu0 %699 }
 0x48b   :  { %2953 = vrcp.f32 %v700_v27 }
 0x48e   :  { %711 = vadd.xlane.f32.xlu0 %v710_v3  ;;  %v673_v7 = vpop.xlane.xlu1 %672 }
 0x48f   :  { %708 = vadd.xlane.f32.xlu1 %v707_v6  ;;  %v681_v9 = vsub.f32 %v3272_v28, %v673_v7 }
 0x491   :  { %v696_v10 = vmul.f32 1.442695, %v681_v9 }
 0x492   :  { %717 = vadd.xlane.f32.xlu0 %v716_v11  ;;  %v892_v20 = vpop.permute.xlu1 %891 }
 0x493   :  { %2955 = vpow2.f32 %v696_v10  ;;  %714 = vadd.xlane.f32.xlu1 %v713_v12  ;;  %v2859_v10 = vld [vmem:[%s3727_s5 + $0x8] sm:$0xff]  }
 0x498   :  { %v2954_v13 = vpop.eup %2953 }
 0x499   :  { %v730_v14 = vmul.f32 %v2954_v13, %v3280_v39 }
 0x49b   :  { %v738_v15 = vpack.c.bf16 %v730_v14, %v730_v14 }
 0x49d   :  { %2723 = vmatmul.mubr.msk.bf16.vlgmr.msra.gmra.mxu1 %vm260_vm9, %v738_v15 }
 0x49e   :  { %2733 = vmatpush3.bf16.msra.mxu1 %v849_v16  ;;  %2734 = vmatprep.mubr.msk.bf16.mxu1 %vm2998_vm8, %v2997_v57 }
 0x49f   :  { %2744 = vmatprep.subr.bf16.mxu1 %v2997_v57 }
 0x4a0   :  { %v3331_v17 = vpop.eup %2955 }
 0x4a1   :  { %v719_v18 = vsel %vm260_vm9, %v3331_v17, 0.0 }
 0x4a2   :  { %720 = vadd.xlane.f32.xlu1 %v719_v18 }
 0x4a8   :  { %1035 = vrot.lane.b32.xlu0 %v3196_v30, %s3003_s4  ;;  %v897_v30 = vsel %vm751_vm10, %v892_v20, 0 }
 0x4b3   :  { %1083 = vrot.lane.b32.xlu1 %v3204_v35, %s3003_s4 }
 0x4e2   :  { %v706_v21 = vpop.xlane.xlu0 %705 }
 0x4e3   :  { %2957 = vrcp.f32 %v706_v21  ;;  %v703_v24 = vpop.xlane.xlu1 %702 }
 0x4e4   :  { %2959 = vrcp.f32 %v703_v24 }
 0x4e6   :  { %v940_v32 = vpop.permute.xlu0 %939 }
 0x4e7   :  { %v945_v38 = vsel %vm751_vm10, %v940_v32, 0  ;;  %v988_v35 = vpop.permute.xlu1 %987 }
 0x4f0   :  { %v2958_v25 = vpop.eup %2957 }
 0x4f1   :  { %v2960_v28 = vpop.eup %2959  ;;  %v732_v29 = vmul.f32 %v2958_v25, %v3288_v50 }
 0x4f2   :  { %v731_v34 = vmul.f32 %v2960_v28, %v3290_v51  ;;  %v993_v51 = vsel %vm751_vm10, %v988_v35, 0 }
 0x4f3   :  { %v740_v36 = vpack.c.bf16 %v732_v29, %v732_v29  ;;  %v2860_v29 = vld [vmem:[%s3727_s5] sm:$0xff]  }
 0x4f4   :  { %v739_v37 = vpack.c.bf16 %v731_v34, %v731_v34 }
 0x4f5   :  { %2735 = vmatmul.mubr.msk.bf16.vlgmr.msra.gmra.mxu1 %vm260_vm9, %v740_v36 }
 0x4f6   :  { %2729 = vmatmul.mubr.msk.bf16.vlgmr.msra.gmra.mxu0 %vm260_vm9, %v739_v37  ;;  %2745 = vmatpush3.bf16.msra.mxu1 %v945_v38 }
 0x4f7   :  { %2739 = vmatpush3.bf16.msra.mxu0 %v897_v30  ;;  %2740 = vmatprep.mubr.msk.bf16.mxu0 %vm2998_vm8, %v2997_v57 }
 0x4f8   :  { %2746 = vmatprep.mubr.msk.bf16.mxu1 %vm2998_vm8, %v2997_v57  ;;  %2750 = vmatprep.subr.bf16.mxu0 %v2997_v57 }
 0x4f9   :  { %2756 = vmatprep.subr.bf16.mxu1 %v2997_v57 }
 0x517   :  { %v712_v39 = vpop.xlane.xlu0 %711 }
 0x518   :  { %2961 = vrcp.f32 %v712_v39  ;;  %v709_v40 = vpop.xlane.xlu1 %708 }
 0x519   :  { %2963 = vrcp.f32 %v709_v40 }
 0x51b   :  { %v718_v41 = vpop.xlane.xlu0 %717 }
 0x51c   :  { %2965 = vrcp.f32 %v718_v41  ;;  %v715_v22 = vpop.xlane.xlu1 %714 }
 0x51d   :  { %2967 = vrcp.f32 %v715_v22 }
 0x51f   :  { %v1036_v43 = vpop.permute.xlu0 %1035 }
 0x520   :  { %v1041_v50 = vsel %vm751_vm10, %v1036_v43, 0 }
 0x525   :  { %v2962_v23 = vpop.eup %2961 }
 0x526   :  { %v2964_v19 = vpop.eup %2963  ;;  %v734_v42 = vmul.f32 %v2962_v23, %v3308_v31 }
 0x527   :  { %v733_v45 = vmul.f32 %v2964_v19, %v3310_v5 }
 0x528   :  { %v742_v46 = vpack.c.bf16 %v734_v42, %v734_v42 }
 0x529   :  { %v2966_v47 = vpop.eup %2965  ;;  %v741_v48 = vpack.c.bf16 %v733_v45, %v733_v45 }
 0x52a   :  { %v2968_v49 = vpop.eup %2967  ;;  %2747 = vmatmul.mubr.msk.bf16.vlgmr.msra.gmra.mxu1 %vm260_vm9, %v742_v46  ;;  %v736_v52 = vmul.f32 %v2966_v47, %v3314_v4 }
 0x52b   :  { %2741 = vmatmul.mubr.msk.bf16.vlgmr.msra.gmra.mxu0 %vm260_vm9, %v741_v48  ;;  %2757 = vmatpush3.bf16.msra.mxu1 %v1041_v50  ;;  %v721_v26 = vpop.xlane.xlu1 %720  ;;  %v735_v53 = vmul.f32 %v2968_v49, %v3318_v8 }
 0x52c   :  { %2751 = vmatpush3.bf16.msra.mxu0 %v993_v51  ;;  %2969 = vrcp.f32 %v721_v26  ;;  %2752 = vmatprep.mubr.msk.bf16.mxu0 %vm2998_vm8, %v2997_v57  ;;  %v744_v55 = vpack.c.bf16 %v736_v52, %v736_v52 }
 0x52d   :  { %2758 = vmatprep.mubr.msk.bf16.mxu1 %vm2998_vm8, %v2997_v57  ;;  %2762 = vmatprep.subr.bf16.mxu0 %v2997_v57  ;;  %v743_v58 = vpack.c.bf16 %v735_v53, %v735_v53  ;;  %v2439_v53 = vld [vmem:[%s3728_s6] ss:$0 sm:$0xff] }
 0x52e   :  { %2768 = vmatprep.subr.bf16.mxu1 %v2997_v57 }
 0x52f   :  { %v1084_v54 = vpop.permute.xlu1 %1083 }
 0x530   :  { %v1089_v56 = vsel %vm751_vm10, %v1084_v54, 0 }
 0x532   :  { %2759 = vmatmul.mubr.msk.bf16.vlgmr.msra.gmra.mxu1 %vm260_vm9, %v744_v55 }
 0x533   :  { %2753 = vmatmul.mubr.msk.bf16.vlgmr.msra.gmra.mxu0 %vm260_vm9, %v743_v58  ;;  %2772 = vmatprep.mubr.msk.bf16.mxu1 %vm2998_vm8, %v2997_v57 }
 0x534   :  { %2763 = vmatpush3.bf16.msra.mxu0 %v1089_v56  ;;  %2764 = vmatprep.mubr.msk.bf16.mxu0 %vm2998_vm8, %v2997_v57 }
 0x535   :  { %2776 = vmatprep.subr.bf16.mxu0 %v2997_v57  ;;  %2769 = vmatpush3.bf16.msra.mxu1 %v2859_v10 }
 0x536   :  { %2770 = vmatprep.subr.bf16.mxu1 %v2997_v57 }
 0x539   :  { %v2970_v59 = vpop.eup %2969  ;;  %2771 = vmatpush3.bf16.msra.mxu1 %v2860_v29 }
 0x53a   :  { %v737_v60 = vmul.f32 %v2970_v59, %v3331_v17 }
 0x53c   :  { %v745_v61 = vpack.c.bf16 %v737_v60, %v737_v60 }
 0x53e   :  { %2765 = vmatmul.mubr.msk.bf16.vlgmr.msra.gmra.mxu0 %vm260_vm9, %v745_v61 }
 0x53f   :  { %2780 = vmatprep.mubr.msk.bf16.mxu0 %vm2998_vm8, %v2997_v57 }
 0x55d   :  { %v789_v62 = vpop.f32.mrf.mxu1 }
 0x55f   :  { %v2724_v63 = vpop.f32.mrf.mxu1 }
 0x561   :  { %v792_v0 = vpop.f32.mrf.mxu1 }
 0x563   :  { %v2725_v1 = vpop.f32.mrf.mxu1 }
 0x5b5   :  { %v885_v31 = vpop.f32.mrf.mxu1 }
 0x5b6   :  { %v837_v2 = vpop.f32.mrf.mxu0 }
 0x5b7   :  { %v2736_v27 = vpop.f32.mrf.mxu1 }
 0x5b8   :  { %v2730_v5 = vpop.f32.mrf.mxu0 }
 0x5b9   :  { %v888_v3 = vpop.f32.mrf.mxu1 }
 0x5ba   :  { %v840_v4 = vpop.f32.mrf.mxu0 }
 0x5bb   :  { %v2737_v6 = vpop.f32.mrf.mxu1 }
 0x5bc   :  { %v2731_v7 = vpop.f32.mrf.mxu0 }
 0x5bd   :  { %v2861_v7 = vld [vmem:[%s3731_s9 + $0x8] sm:$0xff]  }
 0x5be   :  { %2777 = vmatpush3.bf16.msra.mxu0 %v2861_v7  ;;  %v2896_v7 = vld [vmem:[%s3733_s11 + $0x78] sm:$0xff]  }
 0x5bf   :  { %2778 = vmatprep.subr.bf16.mxu0 %v2997_v57 }
 0x5ea   :  { %v981_v8 = vpop.f32.mrf.mxu1 }
 0x5eb   :  { %v933_v9 = vpop.f32.mrf.mxu0 }
 0x5ec   :  { %v2748_v11 = vpop.f32.mrf.mxu1 }
 0x5ed   :  { %v2742_v12 = vpop.f32.mrf.mxu0 }
 0x5ee   :  { %v984_v13 = vpop.f32.mrf.mxu1 }
 0x5ef   :  { %v936_v14 = vpop.f32.mrf.mxu0 }
 0x5f0   :  { %v2749_v15 = vpop.f32.mrf.mxu1 }
 0x5f1   :  { %v2743_v16 = vpop.f32.mrf.mxu0 }
 0x5f2   :  { %v1077_v17 = vpop.f32.mrf.mxu1 }
 0x5f3   :  { %v1029_v18 = vpop.f32.mrf.mxu0  ;;  %v2827_v20 = vpack.i.bf16 %v1077_v17, %v885_v31  ;;  %v2443_v17 = vld [vmem:[%s3729_s7] ss:$0 sm:$0xff] }
 0x5f4   :  { %v2822_v21 = vpack.i.bf16 %v1029_v18, %v837_v2  ;;  %v2760_v24 = vpop.f32.mrf.mxu1 }
 0x5f5   :  { %v2754_v25 = vpop.f32.mrf.mxu0  ;;  %2828 = vrot.lane.b32.xlu1 %v2827_v20, %s3004_s18  ;;  %v2444_v24 = vld [vmem:[%s3730_s8] ss:$0 sm:$0xff] }
 0x5f6   :  { %2823 = vrot.lane.b32.xlu0 %v2822_v21, %s3005_s19  ;;  %v1080_v28 = vpop.f32.mrf.mxu1 }
 0x5f7   :  { %v1032_v32 = vpop.f32.mrf.mxu0 }
 0x5f8   :  { %v2761_v34 = vpop.f32.mrf.mxu1 }
 0x5f9   :  { %v2755_v36 = vpop.f32.mrf.mxu0  ;;  %v2863_v34 = vld [vmem:[%s3733_s11 + $0x78] sm:$0xff]  }
 0x5fa   :  { %v2864_v36 = vld [vmem:[%s3733_s11 + $0x38] sm:$0xff]   ;;  %2566 = vmatprep.subr.bf16.mxu1 %v2863_v34 }
 0x5fe   :  { %v1125_v37 = vpop.f32.mrf.mxu0 }
 0x5ff   :  { %v2832_v38 = vpack.i.bf16 %v1125_v37, %v933_v9  ;;  %v2865_v37 = vld [vmem:[%s3733_s11 + $0x70] sm:$0xff]  }
 0x600   :  { %v2766_v30 = vpop.f32.mrf.mxu0 }
 0x601   :  { %2833 = vrot.lane.b32.xlu0 %v2832_v38, %s3006_s22  ;;  %v2866_v38 = vld [vmem:[%s3733_s11 + $0xf8] sm:$0xff]  }
 0x602   :  { %v1128_v35 = vpop.f32.mrf.mxu0  ;;  %v2868_v30 = vld [vmem:[%s3733_s11 + $0xb8] sm:$0xff]  }
 0x603   :  { %v2870_v35 = vld [vmem:[%s3733_s11 + $0xf0] sm:$0xff]  }
 0x604   :  { %v2767_v39 = vpop.f32.mrf.mxu0 }
 0x605   :  { %v2867_v39 = vld [vmem:[%s3733_s11 + $0x30] sm:$0xff]  }
 0x667   :  { %v2829_v41 = vpop.permute.xlu1 %2828 }
 0x668   :  { %v2824_v40 = vpop.permute.xlu0 %2823  ;;  %v2831_v19 = vunpack.i.h.bf16 %v2829_v41  ;;  %v2830_v42 = vunpack.i.l.bf16 %v2829_v41  ;;  %v2872_v41 = vld [vmem:[%s3733_s11 + $0xb0] sm:$0xff]  }
 0x669   :  { %v2826_v22 = vunpack.i.h.bf16 %v2824_v40  ;;  %v2825_v23 = vunpack.i.l.bf16 %v2824_v40  ;;  %v2869_v40 = vld [vmem:[%s3733_s11 + $0x68] sm:$0xff]  }
 0x66b   :  { %v1160_v43 = vsel %vm260_vm9, %v981_v8, %v2826_v22  ;;  %v1143_v45 = vsel %vm260_vm9, %v789_v62, %v2825_v23  ;;  %v2862_v8 = vld [vmem:[%s3731_s9] sm:$0xff]   ;;  %v2874_v22 = vld [vmem:[%s3733_s11 + $0xe8] sm:$0xff]  }
 0x66c   :  { %v1145_v49 = vsel %vm1144_vm11, %v1143_v45, %v2830_v42  ;;  %v1161_v50 = vsel %vm1144_vm11, %v1160_v43, %v2831_v19  ;;  %2779 = vmatpush3.bf16.msra.mxu0 %v2862_v8  ;;  %v2871_v23 = vld [vmem:[%s3733_s11 + $0x28] sm:$0xff]   ;;  %v2873_v19 = vld [vmem:[%s3733_s11 + $0x60] sm:$0xff]  }
 0x66d   :  { %2588 = vmatprep.subr.bf16.mxu0 %v2866_v38  ;;  %v2876_v42 = vld [vmem:[%s3733_s11 + $0xa8] sm:$0xff]   ;;  %v2878_v43 = vld [vmem:[%s3733_s11 + $0xe0] sm:$0xff]  }
 0x66e   :  { %v2875_v45 = vld [vmem:[%s3733_s11 + $0x20] sm:$0xff]  }
 0x673   :  { %v2834_v46 = vpop.permute.xlu0 %2833 }
 0x674   :  { %v2836_v47 = vunpack.i.h.bf16 %v2834_v46  ;;  %v2835_v48 = vunpack.i.l.bf16 %v2834_v46  ;;  %v2877_v46 = vld [vmem:[%s3733_s11 + $0x58] sm:$0xff]  }
 0x676   :  { %v1162_v51 = vsel %vm1146_vm12, %v1161_v50, %v2836_v47  ;;  %v1147_v26 = vsel %vm1146_vm12, %v1145_v49, %v2835_v48  ;;  %v2880_v47 = vld [vmem:[%s3733_s11 + $0xa0] sm:$0xff]   ;;  %v2882_v48 = vld [vmem:[%s3733_s11 + $0xd8] sm:$0xff]   ;;  %v2881_v50 = vld [vmem:[%s3733_s11 + $0x50] sm:$0xff]  }
 0x677   :  { %v1163_v52 = vpack.c.bf16 %v1162_v51, %v1147_v26  ;;  %v2879_v49 = vld [vmem:[%s3733_s11 + $0x18] sm:$0xff]   ;;  %v2886_v26 = vld [vmem:[%s3733_s11 + $0xd0] sm:$0xff]  }
 0x678   :  { %v2884_v51 = vld [vmem:[%s3733_s11 + $0x98] sm:$0xff]  }
 0x679   :  { %2773 = vmatmul.mubr.msk.bf16.vlgmr.msra.gmra.mxu1 %vm117_vm7, %v1163_v52  ;;  %v2883_v52 = vld [vmem:[%s3733_s11 + $0x10] sm:$0xff]  }
 0x67a   :  { %2567 = vmatpush3.bf16.msra.mxu1 %v2864_v36 }
 0x67b   :  { %2568 = vmatprep.subr.bf16.mxu1 %v2865_v37 }
 0x67e   :  { %2569 = vmatpush3.bf16.msra.mxu1 %v2867_v39 }
 0x67f   :  { %2570 = vmatprep.subr.bf16.mxu1 %v2869_v40 }
 0x682   :  { %2571 = vmatpush3.bf16.msra.mxu1 %v2871_v23 }
 0x683   :  { %2572 = vmatprep.subr.bf16.mxu1 %v2873_v19 }
 0x686   :  { %2573 = vmatpush3.bf16.msra.mxu1 %v2875_v45 }
 0x687   :  { %2574 = vmatprep.subr.bf16.mxu1 %v2877_v46  ;;  %v2899_v46 = vld [vmem:[%s3733_s11 + $0x70] sm:$0xff]  }
 0x68a   :  { %2575 = vmatpush3.bf16.msra.mxu1 %v2879_v49  ;;  %v2901_v49 = vld [vmem:[%s3733_s11 + $0x30] sm:$0xff]  }
 0x68b   :  { %2576 = vmatprep.subr.bf16.mxu1 %v2881_v50 }
 0x68e   :  { %2577 = vmatpush3.bf16.msra.mxu1 %v2883_v52  ;;  %v2903_v52 = vld [vmem:[%s3733_s11 + $0x100] sm:$0xff]  }
 0x739   :  { %v1224_v54 = vpop.f32.mrf.mxu1 }
 0x73a   :  { %v1225_v55 = vadd.f32 %v2439_v53, %v1224_v54  ;;  %v2888_v54 = vld [vmem:[%s3733_s11 + $0x90] sm:$0xff]  }
 0x73b   :  { %v2774_v56 = vpop.f32.mrf.mxu1 }
 0x73c   :  { %v3391_v58 = vadd.f32 %v1225_v55, %v3136_v33  ;;  %v2887_v55 = vld [vmem:[%s3733_s11 + $0x8] sm:$0xff]   ;;  %v2445_v56 = vld [vmem:[%s3732_s10] ss:$0 sm:$0xff] }
 0x73d   :  { %v1227_v59 = vpop.f32.mrf.mxu1 }
 0x73e   :  { %v1228_v60 = vadd.f32 %v2439_v53, %v1227_v59  ;;  %v1235_v61 = vsel %vm117_vm7, %v3391_v58, 0.0  ;;  %v2885_v53 = vld [vmem:[%s3733_s11 + $0x48] sm:$0xff]  }
 0x73f   :  { %1236 = vadd.xlane.f32.xlu1 %v1235_v61  ;;  %v2775_v62 = vpop.f32.mrf.mxu1  ;;  %2578 = vmatprep.subr.bf16.mxu1 %v2885_v53  ;;  %v2904_v53 = vld [vmem:[%s3733_s11 + $0x28] sm:$0xff]  }
 0x740   :  { %v3396_v63 = vadd.f32 %v1228_v60, %v3147_v44  ;;  %2579 = vmatpush3.bf16.msra.mxu1 %v2887_v55  ;;  %v2906_v55 = vld [vmem:[%s3733_s11 + $0xf8] sm:$0xff]  }
 0x742   :  { %v1238_v0 = vsel %vm117_vm7, %v3396_v63, 0.0 }
 0x743   :  { %1239 = vadd.xlane.f32.xlu0 %v1238_v0  ;;  %v2889_v0 = vld [vmem:[%s3733_s11 + $0x40] sm:$0xff]  }
 0x744   :  { %2580 = vmatprep.subr.bf16.mxu1 %v2889_v0  ;;  %v2909_v0 = vld [vmem:[%s3733_s11 + $0x58] sm:$0xff]  }
 0x7c8   :  { %v1237_v1 = vpop.xlane.xlu1 %1236 }
 0x7c9   :  { %v1241_v31 = vmul.f32 0.03125, %v1237_v1  ;;  %v2890_v1 = vld [vmem:[%s3733_s11 + $0xc8] sm:$0xff]  }
 0x7cb   :  { %v1243_v2 = vsub.f32 %v3391_v58, %v1241_v31 }
 0x7cc   :  { %v1240_v33 = vpop.xlane.xlu0 %1239 }
 0x7cd   :  { %v1242_v27 = vmul.f32 0.03125, %v1240_v33  ;;  %v1245_v5 = vmul.f32 %v1243_v2, %v1243_v2  ;;  %v2892_v33 = vld [vmem:[%s3733_s11 + $0x88] sm:$0xff]  }
 0x7cf   :  { %v1244_v3 = vsub.f32 %v3396_v63, %v1242_v27  ;;  %v1247_v4 = vsel %vm117_vm7, %v1245_v5, 0.0 }
 0x7d0   :  { %1248 = vadd.xlane.f32.xlu0 %v1247_v4  ;;  %v2893_v4 = vld [vmem:[%s3733_s11 + $0xc0] sm:$0xff]  }
 0x7d1   :  { %v1246_v6 = vmul.f32 %v1244_v3, %v1244_v3 }
 0x7d3   :  { %v1250_v44 = vsel %vm117_vm7, %v1246_v6, 0.0  ;;  %v2894_v6 = vld [vmem:[%s3733_s11 + $0x80] sm:$0xff]  }
 0x7d4   :  { %1251 = vadd.xlane.f32.xlu0 %v1250_v44  ;;  %v1362_v44 = vld [vmem:[#allocation2 + $0x1] sm:$0xff] }
 0x859   :  { %v1249_v9 = vpop.xlane.xlu0 %1248 }
 0x85a   :  { %v1253_v10 = vmul.f32 0.03125, %v1249_v9 }
 0x85c   :  { %v1255_v11 = vadd.f32 1e-05, %v1253_v10 }
 0x85d   :  { %v1252_v12 = vpop.xlane.xlu0 %1251 }
 0x85e   :  { %2971 = vrsqrt.f32 %v1255_v11  ;;  %v1254_v13 = vmul.f32 0.03125, %v1252_v12 }
 0x860   :  { %v1256_v14 = vadd.f32 1e-05, %v1254_v13 }
 0x862   :  { %2973 = vrsqrt.f32 %v1256_v14 }
 0x86b   :  { %v2972_v15 = vpop.eup %2971 }
 0x86c   :  { %v1259_v16 = vmul.f32 %v2972_v15, %v1243_v2  ;;  %v2891_v2 = vld [vmem:[%s3733_s11] sm:$0xff]  }
 0x86d   :  { %2581 = vmatpush3.bf16.msra.mxu1 %v2891_v2  ;;  %v2911_v2 = vld [vmem:[%s3733_s11 + $0x18] sm:$0xff]  }
 0x86e   :  { %v1267_v21 = vmul.f32 %v2443_v17, %v1259_v16  ;;  %2784 = vmatprep.subr.bf16.mxu1 %v2997_v57 }
 0x86f   :  { %v2974_v18 = vpop.eup %2973 }
 0x870   :  { %v1260_v20 = vmul.f32 %v2974_v18, %v1244_v3  ;;  %v1275_v28 = vadd.f32 %v2444_v24, %v1267_v21 }
 0x872   :  { %v1268_v25 = vmul.f32 %v2443_v17, %v1260_v20  ;;  %v1889_v17 = vld [vmem:[#allocation2 + $0x31] sm:$0xff]  ;;  %v1361_v20 = vld [vmem:[#allocation2] sm:$0xff] }
 0x874   :  { %v1276_v29 = vadd.f32 %v2444_v24, %v1268_v25  ;;  %v1363_v24 = vld [vmem:[#allocation2 + $0x2] sm:$0xff] }
 0x876   :  { %v1277_v32 = vpack.c.bf16 %v1276_v29, %v1275_v28 }
 0x878   :  { %2781 = vmatmul.mubr.msk.bf16.vlgmr.msra.gmra.mxu0 %vm117_vm7, %v1277_v32 }
 0x879   :  { %2589 = vmatpush3.bf16.msra.mxu0 %v2868_v30  ;;  %v2895_v30 = vld [vmem:[%s3733_s11 + $0x118] sm:$0xff]  }
 0x87a   :  { %2590 = vmatprep.subr.bf16.mxu0 %v2870_v35 }
 0x87d   :  { %2591 = vmatpush3.bf16.msra.mxu0 %v2872_v41 }
 0x87e   :  { %2592 = vmatprep.subr.bf16.mxu0 %v2874_v22 }
 0x881   :  { %2593 = vmatpush3.bf16.msra.mxu0 %v2876_v42  ;;  %v2897_v42 = vld [vmem:[%s3733_s11 + $0x110] sm:$0xff]  }
 0x882   :  { %2594 = vmatprep.subr.bf16.mxu0 %v2878_v43  ;;  %v2898_v43 = vld [vmem:[%s3733_s11 + $0x38] sm:$0xff]  }
 0x885   :  { %2595 = vmatpush3.bf16.msra.mxu0 %v2880_v47 }
 0x886   :  { %2596 = vmatprep.subr.bf16.mxu0 %v2882_v48  ;;  %v2900_v48 = vld [vmem:[%s3733_s11 + $0x108] sm:$0xff]  }
 0x889   :  { %2597 = vmatpush3.bf16.msra.mxu0 %v2884_v51  ;;  %v2902_v51 = vld [vmem:[%s3733_s11 + $0x68] sm:$0xff]  }
 0x88a   :  { %2598 = vmatprep.subr.bf16.mxu0 %v2886_v26 }
 0x88d   :  { %2599 = vmatpush3.bf16.msra.mxu0 %v2888_v54  ;;  %v2905_v54 = vld [vmem:[%s3733_s11 + $0x60] sm:$0xff]  }
 0x88e   :  { %2600 = vmatprep.subr.bf16.mxu0 %v2890_v1  ;;  %v2910_v1 = vld [vmem:[%s3733_s11 + $0xf0] sm:$0xff]  }
 0x891   :  { %2601 = vmatpush3.bf16.msra.mxu0 %v2892_v33  ;;  %v2912_v33 = vld [vmem:[%s3733_s11 + $0xb0] sm:$0xff]  }
 0x892   :  { %2602 = vmatprep.subr.bf16.mxu0 %v2893_v4  ;;  %v2916_v4 = vld [vmem:[%s3733_s11 + $0xa8] sm:$0xff]  }
 0x895   :  { %2603 = vmatpush3.bf16.msra.mxu0 %v2894_v6  ;;  %v2917_v6 = vld [vmem:[%s3733_s11 + $0x48] sm:$0xff]  }
 0x896   :  { %2615 = vmatprep.subr.bf16.mxu0 %v2896_v7  ;;  %v2919_v7 = vld [vmem:[%s3733_s11 + $0x8] sm:$0xff]  }
 0x938   :  { %v1338_v59 = vpop.f32.mrf.mxu0 }
 0x939   :  { %v1339_v60 = vadd.f32 %v2445_v56, %v1338_v59  ;;  %v2907_v59 = vld [vmem:[%s3733_s11 + $0x20] sm:$0xff]  }
 0x93a   :  { %v2782_v61 = vpop.f32.mrf.mxu0 }
 0x93b   :  { %v1345_v62 = vmax.f32 %v1339_v60, 0.0  ;;  %v2908_v60 = vld [vmem:[%s3733_s11 + $0xb8] sm:$0xff]  }
 0x93c   :  { %v1341_v31 = vpop.f32.mrf.mxu0 }
 0x93d   :  { %1358 = vst.msk [vmem:[#allocation2 + $0x11] sm:$0xff] %vm1347_vm13, %v1345_v62  ;;  %v1342_v27 = vadd.f32 %v2445_v56, %v1341_v31  ;;  %v1888_v56 = vld [vmem:[#allocation2 + $0x30] sm:$0xff] }
 0x93e   :  { %v2783_v5 = vpop.f32.mrf.mxu0 }
 0x93f   :  { %v1346_v3 = vmax.f32 %v1342_v27, 0.0  ;;  %v2913_v27 = vld [vmem:[%s3733_s11 + $0x50] sm:$0xff]   ;;  %v2914_v5 = vld [vmem:[%s3733_s11 + $0xe8] sm:$0xff]  }
 0x941   :  { %1360 = vst.msk [vmem:[#allocation2 + $0x21] sm:$0xff] %vm1347_vm13, %v1346_v3  ;;  %v2915_v3 = vld [vmem:[%s3733_s11 + $0x10] sm:$0xff]  }
 0x944   :  { %v3535_v8 = vld [vmem:[#allocation2 + $0x10] sm:$0xff] }
 0x945   :  { %v2837_v9 = vpack.i.bf16 %v1362_v44, %v3535_v8  ;;  %v1882_v10 = vld [vmem:[#allocation2 + $0x11] sm:$0xff]  ;;  %v2918_v44 = vld [vmem:[%s3733_s11 + $0xe0] sm:$0xff]  }
 0x946   :  { %v1366_v12 = vld [vmem:[#allocation2 + $0x12] sm:$0xff] }
 0x947   :  { %2838 = vrot.lane.b32.xlu1 %v2837_v9, %s3003_s4  ;;  %v2920_v9 = vld [vmem:[%s3733_s11 + $0xa0] sm:$0xff]  }
 0x948   :  { %v1884_v11 = vld [vmem:[#allocation2 + $0x20] sm:$0xff] }
 0x949   :  { %v3539_v13 = vld [vmem:[#allocation2 + $0x21] sm:$0xff]  ;;  %v2847_v14 = vpack.i.bf16 %v1882_v10, %v1884_v11 }
 0x94a   :  { %v2842_v15 = vpack.i.bf16 %v1366_v12, %v3539_v13  ;;  %v3542_v16 = vld [vmem:[#allocation2 + $0x22] sm:$0xff] }
 0x94b   :  { %2848 = vrot.lane.b32.xlu1 %v2847_v14, %s3003_s4  ;;  %v2852_v18 = vpack.i.bf16 %v3542_v16, %v1889_v17  ;;  %v1394_v62 = vpack.c.bf16 %v3542_v16, %v3542_v16  ;;  %v2923_v14 = vld [vmem:[%s3733_s11] sm:$0xff]   ;;  %v2925_v16 = vld [vmem:[%s3733_s11 + $0xd0] sm:$0xff]  }
 0x94c   :  { %2843 = vrot.lane.b32.xlu0 %v2842_v15, %s3003_s4  ;;  %v2924_v15 = vld [vmem:[%s3733_s11 + $0x98] sm:$0xff]  }
 0x94f   :  { %2853 = vrot.lane.b32.xlu1 %v2852_v18, %s3003_s4  ;;  %v2926_v18 = vld [vmem:[%s3733_s11 + $0x90] sm:$0xff]  }
 0x9b9   :  { %v2839_v21 = vpop.permute.xlu1 %2838 }
 0x9ba   :  { %v2841_v25 = vunpack.i.h.bf16 %v2839_v21  ;;  %v2840_v28 = vunpack.i.l.bf16 %v2839_v21 }
 0x9bc   :  { %v1386_v29 = vsel %vm1347_vm13, %v1361_v20, %v2841_v25  ;;  %v1387_v32 = vsel %vm1347_vm13, %v1363_v24, %v2840_v28  ;;  %v2927_v20 = vld [vmem:[%s3733_s11 + $0x118] sm:$0xff]   ;;  %v2928_v24 = vld [vmem:[%s3733_s11 + $0xc8] sm:$0xff]   ;;  %v2930_v25 = vld [vmem:[%s3733_s11 + $0x110] sm:$0xff]  }
 0x9bd   :  { %v1390_v34 = vpack.c.bf16 %v1386_v29, %v1386_v29  ;;  %v3550_v36 = vpop.permute.xlu1 %2848  ;;  %v1391_v38 = vpack.c.bf16 %v1387_v32, %v1387_v32  ;;  %v2931_v28 = vld [vmem:[%s3733_s11 + $0xc0] sm:$0xff]  }
 0x9be   :  { %v2844_v37 = vpop.permute.xlu0 %2843  ;;  %v2850_v35 = vunpack.i.l.bf16 %v3550_v36  ;;  %v2932_v32 = vld [vmem:[%s3733_s11 + $0x80] sm:$0xff]  }
 0x9bf   :  { %v2846_v39 = vunpack.i.h.bf16 %v2844_v37  ;;  %v2845_v40 = vunpack.i.l.bf16 %v2844_v37  ;;  %1725 = vmatprep.mubr.bf16.mxu1 %v1391_v38  ;;  %v2934_v37 = vld [vmem:[%s3733_s11 + $0x100] sm:$0xff]   ;;  %v1890_v38 = vld [vmem:[#allocation2 + $0x32] sm:$0xff] }
 0x9c0   :  { %1726 = vmatmul.mubr.bf16.vlgmr.msra.gmra.mxu1 %v1390_v34  ;;  %v1908_v45 = vsel %vm1347_vm13, %v1366_v12, %v2850_v35  ;;  %v2851_v12 = vunpack.i.h.bf16 %v3550_v36  ;;  %v2933_v34 = vld [vmem:[%s3733_s11 + $0x108] sm:$0xff]   ;;  %v1915_v35 = vpack.c.bf16 %v1890_v38, %v1890_v38 }
 0x9c1   :  { %v1388_v41 = vsel %vm1347_vm13, %v1882_v10, %v2846_v39  ;;  %v1389_v22 = vsel %vm1347_vm13, %v1884_v11, %v2845_v40  ;;  %2785 = vmatpush3.bf16.msra.mxu1 %v2895_v30  ;;  %2792 = vmatprep.mubr.msk.bf16.mxu1 %vm2998_vm8, %v2997_v57  ;;  %v1912_v47 = vpack.c.bf16 %v1908_v45, %v1908_v45  ;;  %v3577_v50 = vpop.permute.xlu1 %2853  ;;  %v2921_v10 = vld [vmem:[%s3733_s11 + $0x40] sm:$0xff]   ;;  %v2922_v11 = vld [vmem:[%s3733_s11 + $0xd8] sm:$0xff]  }
 0x9c2   :  { %v1392_v23 = vpack.c.bf16 %v1388_v41, %v1388_v41  ;;  %v1393_v19 = vpack.c.bf16 %v1389_v22, %v1389_v22  ;;  %2786 = vmatprep.subr.bf16.mxu1 %v2997_v57  ;;  %v2855_v26 = vunpack.i.l.bf16 %v3577_v50  ;;  %v1907_v17 = vsel %vm1347_vm13, %v3535_v8, %v2851_v12  ;;  %v2929_v8 = vld [vmem:[%s3733_s11 + $0x88] sm:$0xff]  }
 0x9c3   :  { %v1911_v21 = vpack.c.bf16 %v1907_v17, %v1907_v17  ;;  %v2856_v29 = vunpack.i.h.bf16 %v3577_v50 }
 0x9c4   :  { %1765 = vmatprep.mubr.bf16.mxu0 %v1393_v19  ;;  %v1910_v61 = vsel %vm1347_vm13, %v1888_v56, %v2855_v26 }
 0x9c5   :  { %1766 = vmatmul.mubr.bf16.vlgmr.msra.gmra.mxu0 %v1392_v23  ;;  %2787 = vmatpush3.bf16.msra.mxu1 %v2897_v42  ;;  %v1914_v31 = vpack.c.bf16 %v1910_v61, %v1910_v61  ;;  %v1909_v36 = vsel %vm1347_vm13, %v3539_v13, %v2856_v29 }
 0x9c6   :  { %2616 = vmatpush3.bf16.msra.mxu0 %v2898_v43  ;;  %2246 = vmatprep.mubr.bf16.mxu0 %v1912_v47  ;;  %v1913_v30 = vpack.c.bf16 %v1909_v36, %v1909_v36  ;;  %v3007_v43 = vmov 1966171168  }
 0x9c7   :  { %2788 = vmatprep.subr.bf16.mxu1 %v2997_v57  ;;  %2617 = vmatprep.subr.bf16.mxu0 %v2899_v46  ;;  %v1817_v45 = vunpack.c.l.s4 %v3007_v43  ;;  %v1819_v46 = vlaneseq }
 0x9c9   :  { %2789 = vmatpush3.bf16.msra.mxu1 %v2900_v48  ;;  %v1818_v50 = vunpack.c.0.s8 %v1817_v45 }
 0x9ca   :  { %2618 = vmatpush3.bf16.msra.mxu0 %v2901_v49  ;;  %2790 = vmatprep.subr.bf16.mxu1 %v2997_v57 }
 0x9cb   :  { %2619 = vmatprep.subr.bf16.mxu0 %v2902_v51  ;;  %v1820_v51 = vshrl.u32 %v1819_v46, 7 }
 0x9cd   :  { %2791 = vmatpush3.bf16.msra.mxu1 %v2903_v52 }
 0x9ce   :  { %2620 = vmatpush3.bf16.msra.mxu0 %v2904_v53  ;;  %2637 = vmatprep.subr.bf16.mxu1 %v2906_v55 }
 0x9cf   :  { %2621 = vmatprep.subr.bf16.mxu0 %v2905_v54  ;;  %v1821_v54 = vsub.s32 %v1818_v50, %v1820_v51 }
 0x9d0   :  { %2793 = vmatmul.mubr.msk.bf16.vlgmr.msra.gmra.mxu1 %vm1347_vm13, %v1394_v62 }
 0x9d1   :  { %2638 = vmatpush3.bf16.msra.mxu1 %v2908_v60  ;;  %2286 = vmatprep.mubr.bf16.mxu1 %v1914_v31 }
 0x9d2   :  { %2622 = vmatpush3.bf16.msra.mxu0 %v2907_v59  ;;  %2639 = vmatprep.subr.bf16.mxu1 %v2910_v1 }
 0x9d3   :  { %2623 = vmatprep.subr.bf16.mxu0 %v2909_v0 }
 0x9d5   :  { %2640 = vmatpush3.bf16.msra.mxu1 %v2912_v33 }
 0x9d6   :  { %2624 = vmatpush3.bf16.msra.mxu0 %v2911_v2  ;;  %2641 = vmatprep.subr.bf16.mxu1 %v2914_v5 }
 0x9d7   :  { %2625 = vmatprep.subr.bf16.mxu0 %v2913_v27 }
 0x9d9   :  { %2642 = vmatpush3.bf16.msra.mxu1 %v2916_v4 }
 0x9da   :  { %2626 = vmatpush3.bf16.msra.mxu0 %v2915_v3  ;;  %2643 = vmatprep.subr.bf16.mxu1 %v2918_v44 }
 0x9db   :  { %2627 = vmatprep.subr.bf16.mxu0 %v2917_v6 }
 0x9dd   :  { %2644 = vmatpush3.bf16.msra.mxu1 %v2920_v9 }
 0x9de   :  { %2628 = vmatpush3.bf16.msra.mxu0 %v2919_v7  ;;  %2645 = vmatprep.subr.bf16.mxu1 %v2922_v11 }
 0x9df   :  { %2629 = vmatprep.subr.bf16.mxu0 %v2921_v10 }
 0x9e1   :  { %2646 = vmatpush3.bf16.msra.mxu1 %v2924_v15 }
 0x9e2   :  { %2630 = vmatpush3.bf16.msra.mxu0 %v2923_v14  ;;  %2647 = vmatprep.subr.bf16.mxu1 %v2925_v16 }
 0x9e3   :  { %2796 = vmatprep.subr.bf16.mxu0 %v2997_v57 }
 0x9e5   :  { %2247 = vmatmul.mubr.bf16.vlgmr.msra.gmra.mxu0 %v1911_v21  ;;  %2648 = vmatpush3.bf16.msra.mxu1 %v2926_v18 }
 0x9e6   :  { %2797 = vmatpush3.bf16.msra.mxu0 %v2927_v20  ;;  %2649 = vmatprep.subr.bf16.mxu1 %v2928_v24 }
 0x9e7   :  { %2798 = vmatprep.subr.bf16.mxu0 %v2997_v57  ;;  %2804 = vmatprep.mubr.msk.bf16.mxu0 %vm2998_vm8, %v2997_v57 }
 0x9e9   :  { %2650 = vmatpush3.bf16.msra.mxu1 %v2929_v8 }
 0x9ea   :  { %2799 = vmatpush3.bf16.msra.mxu0 %v2930_v25  ;;  %2651 = vmatprep.subr.bf16.mxu1 %v2931_v28 }
 0x9eb   :  { %2800 = vmatprep.subr.bf16.mxu0 %v2997_v57 }
 0x9ed   :  { %2652 = vmatpush3.bf16.msra.mxu1 %v2932_v32 }
 0x9ee   :  { %2801 = vmatpush3.bf16.msra.mxu0 %v2933_v34 }
 0x9ef   :  { %2802 = vmatprep.subr.bf16.mxu0 %v2997_v57  ;;  %v2449_v57 = vld [vmem:[%s3734_s12] ss:$0 sm:$0xff]  ;;  %s3008_s12 = smov [#allocation3]  }
 0x9f0   :  { %2287 = vmatmul.mubr.bf16.vlgmr.msra.gmra.mxu1 %v1913_v30  ;;  %s2406_s17 = sshll.u32 %s3008_s12, 4  ;;  %s2407_s17 = int_to_ptr.vmem [resolvable:$true] %s2406_s17 }
 0x9f1   :  { %s2975_s18 = scalar_lea.vmem %s2407_s17, 256  ;;  %p2980_p1 = scmp.lt.s32.totalorder %s2407_s17, %s2407_s17 }
 0x9f2   :  { %2803 = vmatpush3.bf16.msra.mxu0 %v2934_v37  ;;  %p2976_p0 = scmp.ne.s32.totalorder %s2407_s17, %s2975_s18  ;;  %p2981_p2 = scmp.lt.s32.totalorder %s2975_s18, %s2975_s18 }
 0x9f4   :  { %p2982_p3 = por %p2981_p2, %p2980_p1 }
 0x9f5   :  { %2805 = vmatmul.mubr.msk.bf16.vlgmr.msra.gmra.mxu0 %vm1347_vm13, %v1915_v35 }
 0x9f6   :  { %p2983_p4 = pnand %p2982_p3, %p2976_p0 }
 0xa80   :  { %v2582_v39 = vpop.f32.mrf.mxu1 }
 0xa82   :  { %v2583_v40 = vpop.f32.mrf.mxu1 }
 0xa83   :  { %v2584_v42 = vadd.f32 %v2583_v40, %v2582_v39 }
 0xa84   :  { %v2585_v41 = vpop.f32.mrf.mxu1 }
 0xa85   :  { %v2604_v22 = vpop.f32.mrf.mxu0  ;;  %v1728_v49 = vadd.f32 %v2584_v42, %v2449_v57 }
 0xa86   :  { %v2586_v13 = vpop.f32.mrf.mxu1 }
 0xa87   :  { %v2605_v23 = vpop.f32.mrf.mxu0 }
 0xa88   :  { %v2606_v48 = vadd.f32 %v2605_v23, %v2604_v22 }
 0xa89   :  { %v2607_v19 = vpop.f32.mrf.mxu0 }
 0xa8a   :  { %v1768_v26 = vadd.f32 %v2606_v48, %v1728_v49 }
 0xa8b   :  { %v2608_v47 = vpop.f32.mrf.mxu0 }
 0xa90   :  { %v1807_v52 = vpop.f32.mrf.mxu1 }
 0xa91   :  { %v1808_v53 = vadd.f32 %v1807_v52, %v1768_v26 }
 0xa92   :  { %v2794_v55 = vpop.f32.mrf.mxu1 }
 0xa93   :  { %v1813_v56 = vadd.f32 %v1808_v53, %v3391_v58 }
 0xa94   :  { %v1810_v59 = vpop.f32.mrf.mxu1 }
 0xa95   :  { %v1815_v60 = vcombine.high %v1813_v56, %v1813_v56  ;;  %v1822_v61 = vrot.slane %v1813_v56, %v1821_v54 }
 0xa96   :  { %v2795_v62 = vpop.f32.mrf.mxu1 }
 0xa97   :  { %v1829_v0 = vrot.slane %v1815_v60, %v1821_v54  ;;  %v1830_v1 = vcombine.high %v1822_v61, %v1822_v61  ;;  %v1838_v31 = vrot.slane %v1822_v61, %v1821_v54 }
 0xa99   :  { %v1831_v2 = vcombine.high %v1829_v0, %v1829_v0  ;;  %v1845_v33 = vrot.slane %v1829_v0, %v1821_v54  ;;  %v1852_v27 = vrot.slane %v1830_v1, %v1821_v54  ;;  %v1860_v5 = vcombine.high %v1838_v31, %v1838_v31  ;;  %1873 = vst.msk [vmem:[#allocation3] sm:$0x1] %vm1872_vm15, %v1838_v31 }
 0xa9b   :  { %v1859_v3 = vrot.slane %v1831_v2, %v1821_v54  ;;  %v1861_v4 = vcombine.high %v1845_v33, %v1845_v33  ;;  %v1862_v6 = vcombine.high %v1852_v27, %v1852_v27  ;;  %1874 = vst.msk [vmem:[#allocation3 + $0x2] sm:$0x1] %vm1872_vm15, %v1852_v27  ;;  %1875 = vst.msk [vmem:[#allocation3 + $0x4] sm:$0x1] %vm1872_vm15, %v1860_v5 }
 0xa9c   :  { %1877 = vst.msk [vmem:[#allocation3 + $0x8] sm:$0x1] %vm1872_vm15, %v1845_v33 }
 0xa9d   :  { %v1863_v58 = vcombine.high %v1859_v3, %v1859_v3  ;;  %1876 = vst.msk [vmem:[#allocation3 + $0x6] sm:$0x1] %vm1872_vm15, %v1862_v6  ;;  %1878 = vst.msk [vmem:[#allocation3 + $0xa] sm:$0x1] %vm1872_vm15, %v1859_v3 }
 0xa9e   :  { %1879 = vst.msk [vmem:[#allocation3 + $0xc] sm:$0x1] %vm1872_vm15, %v1861_v4 }
 0xa9f   :  { %1880 = vst.msk [vmem:[#allocation3 + $0xe] sm:$0x1] %vm1872_vm15, %v1863_v58 }
 0xaa5   :  { %v2631_v44 = vpop.f32.mrf.mxu0 }
 0xaa7   :  { %v2632_v7 = vpop.f32.mrf.mxu0 }
 0xaa8   :  { %v2633_v11 = vadd.f32 %v2632_v7, %v2631_v44 }
 0xaa9   :  { %v2634_v9 = vpop.f32.mrf.mxu0 }
 0xaaa   :  { %v2249_v15 = vadd.f32 %v2633_v11, %v2449_v57 }
 0xaab   :  { %v2635_v10 = vpop.f32.mrf.mxu0 }
 0xab0   :  { %v2653_v12 = vpop.f32.mrf.mxu1 }
 0xab2   :  { %v2654_v14 = vpop.f32.mrf.mxu1 }
 0xab3   :  { %v2655_v16 = vadd.f32 %v2654_v14, %v2653_v12 }
 0xab4   :  { %v2656_v17 = vpop.f32.mrf.mxu1 }
 0xab5   :  { %v2328_v18 = vpop.f32.mrf.mxu0  ;;  %v2289_v20 = vadd.f32 %v2655_v16, %v2249_v15 }
 0xab6   :  { %v2657_v21 = vpop.f32.mrf.mxu1 }
 0xab7   :  { %v2806_v24 = vpop.f32.mrf.mxu0  ;;  %v2329_v8 = vadd.f32 %v2328_v18, %v2289_v20 }
 0xab9   :  { %v2331_v25 = vpop.f32.mrf.mxu0  ;;  %v2334_v28 = vadd.f32 %v2329_v8, %v3396_v63 }
 0xabb   :  { %v2807_v29 = vpop.f32.mrf.mxu0  ;;  %v2336_v32 = vcombine.high %v2334_v28, %v2334_v28  ;;  %v2343_v34 = vrot.slane %v2334_v28, %v1821_v54 }
 0xabd   :  { %v2350_v36 = vrot.slane %v2336_v32, %v1821_v54  ;;  %v2351_v37 = vcombine.high %v2343_v34, %v2343_v34  ;;  %v2359_v38 = vrot.slane %v2343_v34, %v1821_v54 }
 0xabf   :  { %v2352_v30 = vcombine.high %v2350_v36, %v2350_v36  ;;  %v2366_v35 = vrot.slane %v2350_v36, %v1821_v54  ;;  %v2373_v39 = vrot.slane %v2351_v37, %v1821_v54  ;;  %v2381_v40 = vcombine.high %v2359_v38, %v2359_v38  ;;  %2393 = vst.msk [vmem:[#allocation3 + $0x1] sm:$0x1] %vm1872_vm15, %v2359_v38 }
 0xac1   :  { %v2380_v41 = vrot.slane %v2352_v30, %v1821_v54  ;;  %v2382_v22 = vcombine.high %v2366_v35, %v2366_v35  ;;  %v2383_v13 = vcombine.high %v2373_v39, %v2373_v39  ;;  %2394 = vst.msk [vmem:[#allocation3 + $0x3] sm:$0x1] %vm1872_vm15, %v2373_v39  ;;  %2395 = vst.msk [vmem:[#allocation3 + $0x5] sm:$0x1] %vm1872_vm15, %v2381_v40 }
 0xac2   :  { %2397 = vst.msk [vmem:[#allocation3 + $0x9] sm:$0x1] %vm1872_vm15, %v2366_v35 }
 0xac3   :  { %v2384_v63 = vcombine.high %v2380_v41, %v2380_v41  ;;  %2396 = vst.msk [vmem:[#allocation3 + $0x7] sm:$0x1] %vm1872_vm15, %v2383_v13  ;;  %2398 = vst.msk [vmem:[#allocation3 + $0xb] sm:$0x1] %vm1872_vm15, %v2380_v41 }
 0xac4   :  { %2399 = vst.msk [vmem:[#allocation3 + $0xd] sm:$0x1] %vm1872_vm15, %v2382_v22 }
 0xac5   :  { %2400 = vst.msk [vmem:[#allocation3 + $0xf] sm:$0x1] %vm1872_vm15, %v2384_v63 }
 0xac6   :  { %2986 = shalt.err (!%p2983_p4)
}
 0xac7   :  { %s3009_s19 = smov 32   ;;  %s3010_s20 = smov 2  }
 0xac8   :  { %2412 = dma.vmem_to_hbm [thread:$0]  %s2407_s17, 256, %s3735_s13, [#allocation4], %s3009_s19, %s3009_s19, %s3010_s20  }
 0xac9   :  { %2995 = dma.done.wait [#allocation4], 256  }
 0xaca   :  { %2996 = vsyncadd [#allocation4], 4294967040 }
 0xacb   :  { %2416 = vsyncpa [#allocation4], 1 }

</bundles_post_ra>
